<compile_context>
chip_gen: v5e
topology: v5e:2x2
jax: 0.10.0
libtpu: 0.0.40
codegen_flags: <defaults>
</compile_context>

<pallas_src>
import functools

import jax
import jax.numpy as jnp
from jax import lax
from jax.experimental import pallas as pl
from jax.experimental.pallas import tpu as pltpu

HIDDEN = 100      # module: self.hidden_size = 100
HP = 128          # lane-padded hidden size (multiple of 128)


def _encoder_gru_kernel(
    x_ref,        # VMEM (T_pad, HP)   f32 : embedded tokens (padded rows zero)
    wih_ref,      # VMEM (HP, 3*HP)    bf16: [W_ir | W_iz | W_in]^T, gates at lanes 0/128/256
    whh_ref,      # VMEM (HP, 3*HP)    bf16: [W_hr | W_hz | W_hn]^T
    bi_ref,       # VMEM (1, 3*HP)     f32 : [b_ir+b_hr | b_iz+b_hz | b_in]
    bhn_ref,      # VMEM (1, HP)       f32 : b_hn (n-gate hidden bias)
    h0_ref,       # VMEM (1, HP)       f32 : initial hidden state (pad lanes zero)
    out_ref,      # VMEM (T_pad, HP)   f32 : out[t] = h_{t+1} (resident, one writeback)
    gi_scratch,   # VMEM (T_pad, 3*HP) f32 : precomputed input projections
    *,
    seq_len,      # static Python int: actual T
):
    # Deterministic padded output rows.
    out_ref[...] = jnp.zeros_like(out_ref)

    # --- Phase 1: dense input projection for all T steps (off the critical path).
    # gi[t] = x_t @ W_ih + b_ih, with b_hh for the r/z gates folded in.
    gi_scratch[...] = (
        jnp.dot(x_ref[...].astype(jnp.bfloat16), wih_ref[...],
                preferred_element_type=jnp.float32)
        + bi_ref[...]
    )

    # --- Phase 2: sequential GRU recurrence (PyTorch gate order r, z, n).
    def step(t, h):
        gi = gi_scratch[pl.ds(t, 1), :]                       # (1, 3*HP) f32
        gh = jnp.dot(h.astype(jnp.bfloat16), whh_ref[...],
                     preferred_element_type=jnp.float32)      # (1, 3*HP) f32

        # Lane-aligned 128-wide gate slices; elementwise math in f32 (v5e-safe).
        r = jax.nn.sigmoid(gi[:, 0:HP] + gh[:, 0:HP])
        z = jax.nn.sigmoid(gi[:, HP:2 * HP] + gh[:, HP:2 * HP])
        n = jnp.tanh(gi[:, 2 * HP:3 * HP] + r * (gh[:, 2 * HP:3 * HP] + bhn_ref[...]))
        h_new = (1.0 - z) * n + z * h                          # (1, HP) f32

        out_ref[pl.ds(t, 1), :] = h_new
        return h_new

    lax.fori_loop(0, seq_len, step, h0_ref[...], unroll=(seq_len <= 32))


def _pack_params(embeddings, w_ih, w_hh, b_ih, b_hh):
    """Pad HIDDEN->128, transpose weights to (in, out) with gate blocks at lane
    offsets 0/128/256, cast matmul weights to bf16, and prepack biases:
    combined [b_ir+b_hr | b_iz+b_hz | b_in] plus a separate b_hn vector."""
    emb_p = jnp.zeros((embeddings.shape[0], HP), jnp.float32).at[:, :HIDDEN].set(
        embeddings.astype(jnp.float32))

    def pack_w(w):  # w: (3*HIDDEN, HIDDEN) PyTorch GRU layout [W_r; W_z; W_n]
        wp = jnp.zeros((HP, 3 * HP), jnp.float32)
        for g in range(3):
            blk = w[g * HIDDEN:(g + 1) * HIDDEN, :]            # (H, H)
            wp = wp.at[:HIDDEN, g * HP:g * HP + HIDDEN].set(blk.T)
        return wp.astype(jnp.bfloat16)

    # Combined bias for gi precompute: r/z gates get b_ih + b_hh, n gate gets b_in only.
    bi = jnp.zeros((1, 3 * HP), jnp.float32)
    for g in range(3):
        b = b_ih[g * HIDDEN:(g + 1) * HIDDEN]
        if g < 2:
            b = b + b_hh[g * HIDDEN:(g + 1) * HIDDEN]
        bi = bi.at[0, g * HP:g * HP + HIDDEN].set(b)

    bhn = jnp.zeros((1, HP), jnp.float32).at[0, :HIDDEN].set(b_hh[2 * HIDDEN:3 * HIDDEN])

    return {
        "emb": emb_p,
        "wih": pack_w(w_ih),
        "whh": pack_w(w_hh),
        "bi": bi,
        "bhn": bhn,
    }


@jax.jit
def encoder_rnn_forward(tokens, hidden, packed):
    """Fused multi-step EncoderRNN forward.

    tokens: (T,) int32 token ids (T=1 reproduces one module forward() call)
    hidden: (1, 1, HIDDEN) f32 initial hidden state (initHidden() = zeros)
    returns: (outputs (T, 1, HIDDEN), hidden (1, 1, HIDDEN))
    """
    T = tokens.shape[0]
    T_pad = ((T + 7) // 8) * 8

    emb_p = packed["emb"]
    # Clamp ids (no runtime bounds check inside the kernel / XLA gather).
    toks = jnp.clip(tokens, 0, emb_p.shape[0] - 1)

    # Embedding gather in XLA (not on the recurrent critical path).
    x_seq = jnp.zeros((T_pad, HP), jnp.float32).at[:T].set(emb_p[toks])

    # Padded lanes of h0 must be zero so pad lanes stay zero through the GRU.
    h0 = jnp.zeros((1, HP), jnp.float32).at[:, :HIDDEN].set(hidden.reshape(1, HIDDEN))

    kernel = functools.partial(_encoder_gru_kernel, seq_len=T)

    out_seq = pl.pallas_call(
        kernel,
        out_shape=jax.ShapeDtypeStruct((T_pad, HP), jnp.float32),
        grid=(1,),
        in_specs=[
            pl.BlockSpec((T_pad, HP), lambda i: (0, 0)),
            pl.BlockSpec((HP, 3 * HP), lambda i: (0, 0)),
            pl.BlockSpec((HP, 3 * HP), lambda i: (0, 0)),
            pl.BlockSpec((1, 3 * HP), lambda i: (0, 0)),
            pl.BlockSpec((1, HP), lambda i: (0, 0)),
            pl.BlockSpec((1, HP), lambda i: (0, 0)),
        ],
        out_specs=pl.BlockSpec((T_pad, HP), lambda i: (0, 0)),
        scratch_shapes=[pltpu.VMEM((T_pad, 3 * HP), jnp.float32)],
        compiler_params=pltpu.CompilerParams(
            dimension_semantics=("arbitrary",)),   # single sequential grid step
    )(x_seq, packed["wih"], packed["whh"], packed["bi"], packed["bhn"], h0)

    outputs = out_seq[:T, :HIDDEN].reshape(T, 1, HIDDEN)       # GRU outputs (== hidden per step)
    new_hidden = out_seq[T - 1, :HIDDEN].reshape(1, 1, HIDDEN)  # final hidden state
    return outputs, new_hidden


if __name__ == "__main__":
    key = jax.random.PRNGKey(0)
    k_emb, k_wih, k_whh, k_bih, k_bhh, k_tok = jax.random.split(key, 6)

    VOCAB = 12   # small pretrained vocab
    T = 8        # short example sequence

    # "Pretrained" embedding table (nn.Embedding.from_pretrained(embeddings));
    # embedding dim must equal hidden_size=100 for the GRU input.
    embeddings = 0.1 * jax.random.normal(k_emb, (VOCAB, HIDDEN), jnp.float32)

    # nn.GRU(100, 100) parameters in the PyTorch layout.
    s = 0.1
    w_ih = s * jax.random.normal(k_wih, (3 * HIDDEN, HIDDEN), jnp.float32)
    w_hh = s * jax.random.normal(k_whh, (3 * HIDDEN, HIDDEN), jnp.float32)
    b_ih = s * jax.random.normal(k_bih, (3 * HIDDEN,), jnp.float32)
    b_hh = s * jax.random.normal(k_bhh, (3 * HIDDEN,), jnp.float32)

    packed = _pack_params(embeddings, w_ih, w_hh, b_ih, b_hh)

    tokens = jax.random.randint(k_tok, (T,), 0, VOCAB, jnp.int32)
    hidden0 = jnp.zeros((1, 1, HIDDEN), jnp.float32)    # initHidden()

    outputs, hidden = encoder_rnn_forward(tokens, hidden0, packed)
    jax.block_until_ready((outputs, hidden))

    assert outputs.shape == (T, 1, HIDDEN)
    assert hidden.shape == (1, 1, HIDDEN)
    assert bool(jnp.all(jnp.isfinite(outputs)))
    assert bool(jnp.all(jnp.isfinite(hidden)))

    # Pure-JAX f32 reference (PyTorch GRU semantics) for a sanity check.
    def ref_forward(tokens, h0):
        h = h0.reshape(1, HIDDEN)
        outs = []
        for t in range(tokens.shape[0]):
            x = embeddings[tokens[t]].reshape(1, HIDDEN)
            gi = x @ w_ih.T + b_ih
            gh = h @ w_hh.T + b_hh
            r = jax.nn.sigmoid(gi[:, :HIDDEN] + gh[:, :HIDDEN])
            z = jax.nn.sigmoid(gi[:, HIDDEN:2 * HIDDEN] + gh[:, HIDDEN:2 * HIDDEN])
            n = jnp.tanh(gi[:, 2 * HIDDEN:] + r * gh[:, 2 * HIDDEN:])
            h = (1.0 - z) * n + z * h
            outs.append(h)
        return jnp.stack(outs)[:, None, 0, :], h.reshape(1, 1, HIDDEN)

    ref_out, ref_h = ref_forward(tokens, hidden0)
    assert bool(jnp.max(jnp.abs(outputs - ref_out)) < 5e-2)   # bf16 MXU tolerance
    assert bool(jnp.max(jnp.abs(hidden - ref_h)) < 5e-2)

    print("KERNEL_OK")
</pallas_src>

<mosaic_0001>
module attributes {stable_mosaic.version = 11 : i64} {
  func.func @_encoder_gru_kernel(%arg0: i32, %arg1: memref<8x128xf32, #tpu.memory_space<vmem>>, %arg2: memref<128x384xbf16, #tpu.memory_space<vmem>>, %arg3: memref<128x384xbf16, #tpu.memory_space<vmem>>, %arg4: memref<1x384xf32, #tpu.memory_space<vmem>>, %arg5: memref<1x128xf32, #tpu.memory_space<vmem>>, %arg6: memref<1x128xf32, #tpu.memory_space<vmem>>, %arg7: memref<8x128xf32, #tpu.memory_space<vmem>>, %arg8: memref<8x384xf32, #tpu.memory_space<vmem>>) attributes {dimension_semantics = [#tpu.dimension_semantics<arbitrary>], iteration_bounds = array<i64: 1>, scalar_prefetch = 0 : i64, scratch_operands = 1 : i64, tpu.core_type = #tpu.core_type<tc>, window_params = [{pipeline_mode = #tpu.pipeline_mode<synchronous>, transform_indices = @transform_0, window_bounds = array<i64: 8, 128>}, {pipeline_mode = #tpu.pipeline_mode<synchronous>, transform_indices = @transform_1, window_bounds = array<i64: 128, 384>}, {pipeline_mode = #tpu.pipeline_mode<synchronous>, transform_indices = @transform_2, window_bounds = array<i64: 128, 384>}, {pipeline_mode = #tpu.pipeline_mode<synchronous>, transform_indices = @transform_3, window_bounds = array<i64: 1, 384>}, {pipeline_mode = #tpu.pipeline_mode<synchronous>, transform_indices = @transform_4, window_bounds = array<i64: 1, 128>}, {pipeline_mode = #tpu.pipeline_mode<synchronous>, transform_indices = @transform_5, window_bounds = array<i64: 1, 128>}, {pipeline_mode = #tpu.pipeline_mode<synchronous>, transform_indices = @transform_6, window_bounds = array<i64: 8, 128>}]} {
    %cst = arith.constant 0.000000e+00 : f32
    %0 = vector.broadcast %cst : f32 to vector<8x128xf32>
    %c0 = arith.constant 0 : index
    %c0_0 = arith.constant 0 : index
    %1 = vector.load %arg7[%c0, %c0_0] : memref<8x128xf32, #tpu.memory_space<vmem>>, vector<8x128xf32>
    tpu.vector_store %arg7[%c0, %c0_0], %0 {strides = array<i32>} : memref<8x128xf32, #tpu.memory_space<vmem>>, vector<8x128xf32>,
    %c0_1 = arith.constant 0 : index
    %c0_2 = arith.constant 0 : index
    %2 = vector.load %arg1[%c0_1, %c0_2] : memref<8x128xf32, #tpu.memory_space<vmem>>, vector<8x128xf32>
    %3 = arith.truncf %2 : vector<8x128xf32> to vector<8x128xbf16>
    %c0_3 = arith.constant 0 : index
    %c0_4 = arith.constant 0 : index
    %4 = vector.load %arg2[%c0_3, %c0_4] : memref<128x384xbf16, #tpu.memory_space<vmem>>, vector<128x384xbf16>
    %cst_5 = arith.constant dense<0.000000e+00> : vector<8x384xf32>
    %5 = tpu.matmul %3, %4, %cst_5 {dimension_numbers = #tpu.dot_dimension_numbers<[1], [0], [0], [1], [0, 0, 1, 1], [], []>} : vector<8x128xbf16>, vector<128x384xbf16>, vector<8x384xf32> -> vector<8x384xf32>
    %c0_6 = arith.constant 0 : index
    %c0_7 = arith.constant 0 : index
    %6 = vector.load %arg4[%c0_6, %c0_7] : memref<1x384xf32, #tpu.memory_space<vmem>>, vector<1x384xf32>
    %7 = vector.broadcast %6 : vector<1x384xf32> to vector<8x384xf32>
    %8 = arith.addf %5, %7 : vector<8x384xf32>
    %c0_8 = arith.constant 0 : index
    %c0_9 = arith.constant 0 : index
    %9 = vector.load %arg8[%c0_8, %c0_9] : memref<8x384xf32, #tpu.memory_space<vmem>>, vector<8x384xf32>
    tpu.vector_store %arg8[%c0_8, %c0_9], %8 {strides = array<i32>} : memref<8x384xf32, #tpu.memory_space<vmem>>, vector<8x384xf32>,
    %c0_10 = arith.constant 0 : index
    %c0_11 = arith.constant 0 : index
    %10 = vector.load %arg6[%c0_10, %c0_11] : memref<1x128xf32, #tpu.memory_space<vmem>>, vector<1x128xf32>
    %c0_i32 = arith.constant 0 : i32
    %11 = arith.index_cast %c0_i32 : i32 to index
    %c0_12 = arith.constant 0 : index
    %12 = vector.load %arg8[%11, %c0_12] : memref<8x384xf32, #tpu.memory_space<vmem>>, vector<1x384xf32>
    %13 = arith.truncf %10 : vector<1x128xf32> to vector<1x128xbf16>
    %c0_13 = arith.constant 0 : index
    %c0_14 = arith.constant 0 : index
    %14 = vector.load %arg3[%c0_13, %c0_14] : memref<128x384xbf16, #tpu.memory_space<vmem>>, vector<128x384xbf16>
    %cst_15 = arith.constant dense<0.000000e+00> : vector<1x384xf32>
    %15 = tpu.matmul %13, %14, %cst_15 {dimension_numbers = #tpu.dot_dimension_numbers<[1], [0], [0], [1], [0, 0, 1, 1], [], []>} : vector<1x128xbf16>, vector<128x384xbf16>, vector<1x384xf32> -> vector<1x384xf32>
    %16 = vector.extract_strided_slice %12 {offsets = [0, 0], sizes = [1, 128], strides = [1, 1]} : vector<1x384xf32> to vector<1x128xf32>
    %17 = vector.extract_strided_slice %15 {offsets = [0, 0], sizes = [1, 128], strides = [1, 1]} : vector<1x384xf32> to vector<1x128xf32>
    %18 = arith.addf %16, %17 : vector<1x128xf32>
    %19 = arith.negf %18 : vector<1x128xf32>
    %20 = math.exp %19 : vector<1x128xf32>
    %cst_16 = arith.constant 1.000000e+00 : f32
    %21 = vector.broadcast %cst_16 : f32 to vector<1x128xf32>
    %22 = arith.addf %21, %20 : vector<1x128xf32>
    %23 = arith.divf %21, %22 : vector<1x128xf32>
    %24 = vector.extract_strided_slice %12 {offsets = [0, 128], sizes = [1, 128], strides = [1, 1]} : vector<1x384xf32> to vector<1x128xf32>
    %25 = vector.extract_strided_slice %15 {offsets = [0, 128], sizes = [1, 128], strides = [1, 1]} : vector<1x384xf32> to vector<1x128xf32>
    %26 = arith.addf %24, %25 : vector<1x128xf32>
    %27 = arith.negf %26 : vector<1x128xf32>
    %28 = math.exp %27 : vector<1x128xf32>
    %cst_17 = arith.constant 1.000000e+00 : f32
    %29 = vector.broadcast %cst_17 : f32 to vector<1x128xf32>
    %30 = arith.addf %29, %28 : vector<1x128xf32>
    %31 = arith.divf %29, %30 : vector<1x128xf32>
    %32 = vector.extract_strided_slice %12 {offsets = [0, 256], sizes = [1, 128], strides = [1, 1]} : vector<1x384xf32> to vector<1x128xf32>
    %33 = vector.extract_strided_slice %15 {offsets = [0, 256], sizes = [1, 128], strides = [1, 1]} : vector<1x384xf32> to vector<1x128xf32>
    %c0_18 = arith.constant 0 : index
    %c0_19 = arith.constant 0 : index
    %34 = vector.load %arg5[%c0_18, %c0_19] : memref<1x128xf32, #tpu.memory_space<vmem>>, vector<1x128xf32>
    %35 = arith.addf %33, %34 : vector<1x128xf32>
    %36 = arith.mulf %23, %35 : vector<1x128xf32>
    %37 = arith.addf %32, %36 : vector<1x128xf32>
    %38 = math.tanh %37 : vector<1x128xf32>
    %cst_20 = arith.constant 1.000000e+00 : f32
    %39 = vector.broadcast %cst_20 : f32 to vector<1x128xf32>
    %40 = arith.subf %39, %31 : vector<1x128xf32>
    %41 = arith.mulf %40, %38 : vector<1x128xf32>
    %42 = arith.mulf %31, %10 : vector<1x128xf32>
    %43 = arith.addf %41, %42 : vector<1x128xf32>
    %44 = arith.index_cast %c0_i32 : i32 to index
    %c0_21 = arith.constant 0 : index
    %45 = vector.load %arg7[%44, %c0_21] : memref<8x128xf32, #tpu.memory_space<vmem>>, vector<1x128xf32>
    tpu.vector_store %arg7[%44, %c0_21], %43 {strides = array<i32>} : memref<8x128xf32, #tpu.memory_space<vmem>>, vector<1x128xf32>,
    %c1_i32 = arith.constant 1 : i32
    %46 = arith.index_cast %c1_i32 : i32 to index
    %c0_22 = arith.constant 0 : index
    %47 = vector.load %arg8[%46, %c0_22] : memref<8x384xf32, #tpu.memory_space<vmem>>, vector<1x384xf32>
    %48 = arith.truncf %43 : vector<1x128xf32> to vector<1x128xbf16>
    %c0_23 = arith.constant 0 : index
    %c0_24 = arith.constant 0 : index
    %49 = vector.load %arg3[%c0_23, %c0_24] : memref<128x384xbf16, #tpu.memory_space<vmem>>, vector<128x384xbf16>
    %cst_25 = arith.constant dense<0.000000e+00> : vector<1x384xf32>
    %50 = tpu.matmul %48, %49, %cst_25 {dimension_numbers = #tpu.dot_dimension_numbers<[1], [0], [0], [1], [0, 0, 1, 1], [], []>} : vector<1x128xbf16>, vector<128x384xbf16>, vector<1x384xf32> -> vector<1x384xf32>
    %51 = vector.extract_strided_slice %47 {offsets = [0, 0], sizes = [1, 128], strides = [1, 1]} : vector<1x384xf32> to vector<1x128xf32>
    %52 = vector.extract_strided_slice %50 {offsets = [0, 0], sizes = [1, 128], strides = [1, 1]} : vector<1x384xf32> to vector<1x128xf32>
    %53 = arith.addf %51, %52 : vector<1x128xf32>
    %54 = arith.negf %53 : vector<1x128xf32>
    %55 = math.exp %54 : vector<1x128xf32>
    %cst_26 = arith.constant 1.000000e+00 : f32
    %56 = vector.broadcast %cst_26 : f32 to vector<1x128xf32>
    %57 = arith.addf %56, %55 : vector<1x128xf32>
    %58 = arith.divf %56, %57 : vector<1x128xf32>
    %59 = vector.extract_strided_slice %47 {offsets = [0, 128], sizes = [1, 128], strides = [1, 1]} : vector<1x384xf32> to vector<1x128xf32>
    %60 = vector.extract_strided_slice %50 {offsets = [0, 128], sizes = [1, 128], strides = [1, 1]} : vector<1x384xf32> to vector<1x128xf32>
    %61 = arith.addf %59, %60 : vector<1x128xf32>
    %62 = arith.negf %61 : vector<1x128xf32>
    %63 = math.exp %62 : vector<1x128xf32>
    %cst_27 = arith.constant 1.000000e+00 : f32
    %64 = vector.broadcast %cst_27 : f32 to vector<1x128xf32>
    %65 = arith.addf %64, %63 : vector<1x128xf32>
    %66 = arith.divf %64, %65 : vector<1x128xf32>
    %67 = vector.extract_strided_slice %47 {offsets = [0, 256], sizes = [1, 128], strides = [1, 1]} : vector<1x384xf32> to vector<1x128xf32>
    %68 = vector.extract_strided_slice %50 {offsets = [0, 256], sizes = [1, 128], strides = [1, 1]} : vector<1x384xf32> to vector<1x128xf32>
    %c0_28 = arith.constant 0 : index
    %c0_29 = arith.constant 0 : index
    %69 = vector.load %arg5[%c0_28, %c0_29] : memref<1x128xf32, #tpu.memory_space<vmem>>, vector<1x128xf32>
    %70 = arith.addf %68, %69 : vector<1x128xf32>
    %71 = arith.mulf %58, %70 : vector<1x128xf32>
    %72 = arith.addf %67, %71 : vector<1x128xf32>
    %73 = math.tanh %72 : vector<1x128xf32>
    %cst_30 = arith.constant 1.000000e+00 : f32
    %74 = vector.broadcast %cst_30 : f32 to vector<1x128xf32>
    %75 = arith.subf %74, %66 : vector<1x128xf32>
    %76 = arith.mulf %75, %73 : vector<1x128xf32>
    %77 = arith.mulf %66, %43 : vector<1x128xf32>
    %78 = arith.addf %76, %77 : vector<1x128xf32>
    %79 = arith.index_cast %c1_i32 : i32 to index
    %c0_31 = arith.constant 0 : index
    %80 = vector.load %arg7[%79, %c0_31] : memref<8x128xf32, #tpu.memory_space<vmem>>, vector<1x128xf32>
    tpu.vector_store %arg7[%79, %c0_31], %78 {strides = array<i32>} : memref<8x128xf32, #tpu.memory_space<vmem>>, vector<1x128xf32>,
    %c2_i32 = arith.constant 2 : i32
    %81 = arith.index_cast %c2_i32 : i32 to index
    %c0_32 = arith.constant 0 : index
    %82 = vector.load %arg8[%81, %c0_32] : memref<8x384xf32, #tpu.memory_space<vmem>>, vector<1x384xf32>
    %83 = arith.truncf %78 : vector<1x128xf32> to vector<1x128xbf16>
    %c0_33 = arith.constant 0 : index
    %c0_34 = arith.constant 0 : index
    %84 = vector.load %arg3[%c0_33, %c0_34] : memref<128x384xbf16, #tpu.memory_space<vmem>>, vector<128x384xbf16>
    %cst_35 = arith.constant dense<0.000000e+00> : vector<1x384xf32>
    %85 = tpu.matmul %83, %84, %cst_35 {dimension_numbers = #tpu.dot_dimension_numbers<[1], [0], [0], [1], [0, 0, 1, 1], [], []>} : vector<1x128xbf16>, vector<128x384xbf16>, vector<1x384xf32> -> vector<1x384xf32>
    %86 = vector.extract_strided_slice %82 {offsets = [0, 0], sizes = [1, 128], strides = [1, 1]} : vector<1x384xf32> to vector<1x128xf32>
    %87 = vector.extract_strided_slice %85 {offsets = [0, 0], sizes = [1, 128], strides = [1, 1]} : vector<1x384xf32> to vector<1x128xf32>
    %88 = arith.addf %86, %87 : vector<1x128xf32>
    %89 = arith.negf %88 : vector<1x128xf32>
    %90 = math.exp %89 : vector<1x128xf32>
    %cst_36 = arith.constant 1.000000e+00 : f32
    %91 = vector.broadcast %cst_36 : f32 to vector<1x128xf32>
    %92 = arith.addf %91, %90 : vector<1x128xf32>
    %93 = arith.divf %91, %92 : vector<1x128xf32>
    %94 = vector.extract_strided_slice %82 {offsets = [0, 128], sizes = [1, 128], strides = [1, 1]} : vector<1x384xf32> to vector<1x128xf32>
    %95 = vector.extract_strided_slice %85 {offsets = [0, 128], sizes = [1, 128], strides = [1, 1]} : vector<1x384xf32> to vector<1x128xf32>
    %96 = arith.addf %94, %95 : vector<1x128xf32>
    %97 = arith.negf %96 : vector<1x128xf32>
    %98 = math.exp %97 : vector<1x128xf32>
    %cst_37 = arith.constant 1.000000e+00 : f32
    %99 = vector.broadcast %cst_37 : f32 to vector<1x128xf32>
    %100 = arith.addf %99, %98 : vector<1x128xf32>
    %101 = arith.divf %99, %100 : vector<1x128xf32>
    %102 = vector.extract_strided_slice %82 {offsets = [0, 256], sizes = [1, 128], strides = [1, 1]} : vector<1x384xf32> to vector<1x128xf32>
    %103 = vector.extract_strided_slice %85 {offsets = [0, 256], sizes = [1, 128], strides = [1, 1]} : vector<1x384xf32> to vector<1x128xf32>
    %c0_38 = arith.constant 0 : index
    %c0_39 = arith.constant 0 : index
    %104 = vector.load %arg5[%c0_38, %c0_39] : memref<1x128xf32, #tpu.memory_space<vmem>>, vector<1x128xf32>
    %105 = arith.addf %103, %104 : vector<1x128xf32>
    %106 = arith.mulf %93, %105 : vector<1x128xf32>
    %107 = arith.addf %102, %106 : vector<1x128xf32>
    %108 = math.tanh %107 : vector<1x128xf32>
    %cst_40 = arith.constant 1.000000e+00 : f32
    %109 = vector.broadcast %cst_40 : f32 to vector<1x128xf32>
    %110 = arith.subf %109, %101 : vector<1x128xf32>
    %111 = arith.mulf %110, %108 : vector<1x128xf32>
    %112 = arith.mulf %101, %78 : vector<1x128xf32>
    %113 = arith.addf %111, %112 : vector<1x128xf32>
    %114 = arith.index_cast %c2_i32 : i32 to index
    %c0_41 = arith.constant 0 : index
    %115 = vector.load %arg7[%114, %c0_41] : memref<8x128xf32, #tpu.memory_space<vmem>>, vector<1x128xf32>
    tpu.vector_store %arg7[%114, %c0_41], %113 {strides = array<i32>} : memref<8x128xf32, #tpu.memory_space<vmem>>, vector<1x128xf32>,
    %c3_i32 = arith.constant 3 : i32
    %116 = arith.index_cast %c3_i32 : i32 to index
    %c0_42 = arith.constant 0 : index
    %117 = vector.load %arg8[%116, %c0_42] : memref<8x384xf32, #tpu.memory_space<vmem>>, vector<1x384xf32>
    %118 = arith.truncf %113 : vector<1x128xf32> to vector<1x128xbf16>
    %c0_43 = arith.constant 0 : index
    %c0_44 = arith.constant 0 : index
    %119 = vector.load %arg3[%c0_43, %c0_44] : memref<128x384xbf16, #tpu.memory_space<vmem>>, vector<128x384xbf16>
    %cst_45 = arith.constant dense<0.000000e+00> : vector<1x384xf32>
    %120 = tpu.matmul %118, %119, %cst_45 {dimension_numbers = #tpu.dot_dimension_numbers<[1], [0], [0], [1], [0, 0, 1, 1], [], []>} : vector<1x128xbf16>, vector<128x384xbf16>, vector<1x384xf32> -> vector<1x384xf32>
    %121 = vector.extract_strided_slice %117 {offsets = [0, 0], sizes = [1, 128], strides = [1, 1]} : vector<1x384xf32> to vector<1x128xf32>
    %122 = vector.extract_strided_slice %120 {offsets = [0, 0], sizes = [1, 128], strides = [1, 1]} : vector<1x384xf32> to vector<1x128xf32>
    %123 = arith.addf %121, %122 : vector<1x128xf32>
    %124 = arith.negf %123 : vector<1x128xf32>
    %125 = math.exp %124 : vector<1x128xf32>
    %cst_46 = arith.constant 1.000000e+00 : f32
    %126 = vector.broadcast %cst_46 : f32 to vector<1x128xf32>
    %127 = arith.addf %126, %125 : vector<1x128xf32>
    %128 = arith.divf %126, %127 : vector<1x128xf32>
    %129 = vector.extract_strided_slice %117 {offsets = [0, 128], sizes = [1, 128], strides = [1, 1]} : vector<1x384xf32> to vector<1x128xf32>
    %130 = vector.extract_strided_slice %120 {offsets = [0, 128], sizes = [1, 128], strides = [1, 1]} : vector<1x384xf32> to vector<1x128xf32>
    %131 = arith.addf %129, %130 : vector<1x128xf32>
    %132 = arith.negf %131 : vector<1x128xf32>
    %133 = math.exp %132 : vector<1x128xf32>
    %cst_47 = arith.constant 1.000000e+00 : f32
    %134 = vector.broadcast %cst_47 : f32 to vector<1x128xf32>
    %135 = arith.addf %134, %133 : vector<1x128xf32>
    %136 = arith.divf %134, %135 : vector<1x128xf32>
    %137 = vector.extract_strided_slice %117 {offsets = [0, 256], sizes = [1, 128], strides = [1, 1]} : vector<1x384xf32> to vector<1x128xf32>
    %138 = vector.extract_strided_slice %120 {offsets = [0, 256], sizes = [1, 128], strides = [1, 1]} : vector<1x384xf32> to vector<1x128xf32>
    %c0_48 = arith.constant 0 : index
    %c0_49 = arith.constant 0 : index
    %139 = vector.load %arg5[%c0_48, %c0_49] : memref<1x128xf32, #tpu.memory_space<vmem>>, vector<1x128xf32>
    %140 = arith.addf %138, %139 : vector<1x128xf32>
    %141 = arith.mulf %128, %140 : vector<1x128xf32>
    %142 = arith.addf %137, %141 : vector<1x128xf32>
    %143 = math.tanh %142 : vector<1x128xf32>
    %cst_50 = arith.constant 1.000000e+00 : f32
    %144 = vector.broadcast %cst_50 : f32 to vector<1x128xf32>
    %145 = arith.subf %144, %136 : vector<1x128xf32>
    %146 = arith.mulf %145, %143 : vector<1x128xf32>
    %147 = arith.mulf %136, %113 : vector<1x128xf32>
    %148 = arith.addf %146, %147 : vector<1x128xf32>
    %149 = arith.index_cast %c3_i32 : i32 to index
    %c0_51 = arith.constant 0 : index
    %150 = vector.load %arg7[%149, %c0_51] : memref<8x128xf32, #tpu.memory_space<vmem>>, vector<1x128xf32>
    tpu.vector_store %arg7[%149, %c0_51], %148 {strides = array<i32>} : memref<8x128xf32, #tpu.memory_space<vmem>>, vector<1x128xf32>,
    %c4_i32 = arith.constant 4 : i32
    %151 = arith.index_cast %c4_i32 : i32 to index
    %c0_52 = arith.constant 0 : index
    %152 = vector.load %arg8[%151, %c0_52] : memref<8x384xf32, #tpu.memory_space<vmem>>, vector<1x384xf32>
    %153 = arith.truncf %148 : vector<1x128xf32> to vector<1x128xbf16>
    %c0_53 = arith.constant 0 : index
    %c0_54 = arith.constant 0 : index
    %154 = vector.load %arg3[%c0_53, %c0_54] : memref<128x384xbf16, #tpu.memory_space<vmem>>, vector<128x384xbf16>
    %cst_55 = arith.constant dense<0.000000e+00> : vector<1x384xf32>
    %155 = tpu.matmul %153, %154, %cst_55 {dimension_numbers = #tpu.dot_dimension_numbers<[1], [0], [0], [1], [0, 0, 1, 1], [], []>} : vector<1x128xbf16>, vector<128x384xbf16>, vector<1x384xf32> -> vector<1x384xf32>
    %156 = vector.extract_strided_slice %152 {offsets = [0, 0], sizes = [1, 128], strides = [1, 1]} : vector<1x384xf32> to vector<1x128xf32>
    %157 = vector.extract_strided_slice %155 {offsets = [0, 0], sizes = [1, 128], strides = [1, 1]} : vector<1x384xf32> to vector<1x128xf32>
    %158 = arith.addf %156, %157 : vector<1x128xf32>
    %159 = arith.negf %158 : vector<1x128xf32>
    %160 = math.exp %159 : vector<1x128xf32>
    %cst_56 = arith.constant 1.000000e+00 : f32
    %161 = vector.broadcast %cst_56 : f32 to vector<1x128xf32>
    %162 = arith.addf %161, %160 : vector<1x128xf32>
    %163 = arith.divf %161, %162 : vector<1x128xf32>
    %164 = vector.extract_strided_slice %152 {offsets = [0, 128], sizes = [1, 128], strides = [1, 1]} : vector<1x384xf32> to vector<1x128xf32>
    %165 = vector.extract_strided_slice %155 {offsets = [0, 128], sizes = [1, 128], strides = [1, 1]} : vector<1x384xf32> to vector<1x128xf32>
    %166 = arith.addf %164, %165 : vector<1x128xf32>
    %167 = arith.negf %166 : vector<1x128xf32>
    %168 = math.exp %167 : vector<1x128xf32>
    %cst_57 = arith.constant 1.000000e+00 : f32
    %169 = vector.broadcast %cst_57 : f32 to vector<1x128xf32>
    %170 = arith.addf %169, %168 : vector<1x128xf32>
    %171 = arith.divf %169, %170 : vector<1x128xf32>
    %172 = vector.extract_strided_slice %152 {offsets = [0, 256], sizes = [1, 128], strides = [1, 1]} : vector<1x384xf32> to vector<1x128xf32>
    %173 = vector.extract_strided_slice %155 {offsets = [0, 256], sizes = [1, 128], strides = [1, 1]} : vector<1x384xf32> to vector<1x128xf32>
    %c0_58 = arith.constant 0 : index
    %c0_59 = arith.constant 0 : index
    %174 = vector.load %arg5[%c0_58, %c0_59] : memref<1x128xf32, #tpu.memory_space<vmem>>, vector<1x128xf32>
    %175 = arith.addf %173, %174 : vector<1x128xf32>
    %176 = arith.mulf %163, %175 : vector<1x128xf32>
    %177 = arith.addf %172, %176 : vector<1x128xf32>
    %178 = math.tanh %177 : vector<1x128xf32>
    %cst_60 = arith.constant 1.000000e+00 : f32
    %179 = vector.broadcast %cst_60 : f32 to vector<1x128xf32>
    %180 = arith.subf %179, %171 : vector<1x128xf32>
    %181 = arith.mulf %180, %178 : vector<1x128xf32>
    %182 = arith.mulf %171, %148 : vector<1x128xf32>
    %183 = arith.addf %181, %182 : vector<1x128xf32>
    %184 = arith.index_cast %c4_i32 : i32 to index
    %c0_61 = arith.constant 0 : index
    %185 = vector.load %arg7[%184, %c0_61] : memref<8x128xf32, #tpu.memory_space<vmem>>, vector<1x128xf32>
    tpu.vector_store %arg7[%184, %c0_61], %183 {strides = array<i32>} : memref<8x128xf32, #tpu.memory_space<vmem>>, vector<1x128xf32>,
    %c5_i32 = arith.constant 5 : i32
    %186 = arith.index_cast %c5_i32 : i32 to index
    %c0_62 = arith.constant 0 : index
    %187 = vector.load %arg8[%186, %c0_62] : memref<8x384xf32, #tpu.memory_space<vmem>>, vector<1x384xf32>
    %188 = arith.truncf %183 : vector<1x128xf32> to vector<1x128xbf16>
    %c0_63 = arith.constant 0 : index
    %c0_64 = arith.constant 0 : index
    %189 = vector.load %arg3[%c0_63, %c0_64] : memref<128x384xbf16, #tpu.memory_space<vmem>>, vector<128x384xbf16>
    %cst_65 = arith.constant dense<0.000000e+00> : vector<1x384xf32>
    %190 = tpu.matmul %188, %189, %cst_65 {dimension_numbers = #tpu.dot_dimension_numbers<[1], [0], [0], [1], [0, 0, 1, 1], [], []>} : vector<1x128xbf16>, vector<128x384xbf16>, vector<1x384xf32> -> vector<1x384xf32>
    %191 = vector.extract_strided_slice %187 {offsets = [0, 0], sizes = [1, 128], strides = [1, 1]} : vector<1x384xf32> to vector<1x128xf32>
    %192 = vector.extract_strided_slice %190 {offsets = [0, 0], sizes = [1, 128], strides = [1, 1]} : vector<1x384xf32> to vector<1x128xf32>
    %193 = arith.addf %191, %192 : vector<1x128xf32>
    %194 = arith.negf %193 : vector<1x128xf32>
    %195 = math.exp %194 : vector<1x128xf32>
    %cst_66 = arith.constant 1.000000e+00 : f32
    %196 = vector.broadcast %cst_66 : f32 to vector<1x128xf32>
    %197 = arith.addf %196, %195 : vector<1x128xf32>
    %198 = arith.divf %196, %197 : vector<1x128xf32>
    %199 = vector.extract_strided_slice %187 {offsets = [0, 128], sizes = [1, 128], strides = [1, 1]} : vector<1x384xf32> to vector<1x128xf32>
    %200 = vector.extract_strided_slice %190 {offsets = [0, 128], sizes = [1, 128], strides = [1, 1]} : vector<1x384xf32> to vector<1x128xf32>
    %201 = arith.addf %199, %200 : vector<1x128xf32>
    %202 = arith.negf %201 : vector<1x128xf32>
    %203 = math.exp %202 : vector<1x128xf32>
    %cst_67 = arith.constant 1.000000e+00 : f32
    %204 = vector.broadcast %cst_67 : f32 to vector<1x128xf32>
    %205 = arith.addf %204, %203 : vector<1x128xf32>
    %206 = arith.divf %204, %205 : vector<1x128xf32>
    %207 = vector.extract_strided_slice %187 {offsets = [0, 256], sizes = [1, 128], strides = [1, 1]} : vector<1x384xf32> to vector<1x128xf32>
    %208 = vector.extract_strided_slice %190 {offsets = [0, 256], sizes = [1, 128], strides = [1, 1]} : vector<1x384xf32> to vector<1x128xf32>
    %c0_68 = arith.constant 0 : index
    %c0_69 = arith.constant 0 : index
    %209 = vector.load %arg5[%c0_68, %c0_69] : memref<1x128xf32, #tpu.memory_space<vmem>>, vector<1x128xf32>
    %210 = arith.addf %208, %209 : vector<1x128xf32>
    %211 = arith.mulf %198, %210 : vector<1x128xf32>
    %212 = arith.addf %207, %211 : vector<1x128xf32>
    %213 = math.tanh %212 : vector<1x128xf32>
    %cst_70 = arith.constant 1.000000e+00 : f32
    %214 = vector.broadcast %cst_70 : f32 to vector<1x128xf32>
    %215 = arith.subf %214, %206 : vector<1x128xf32>
    %216 = arith.mulf %215, %213 : vector<1x128xf32>
    %217 = arith.mulf %206, %183 : vector<1x128xf32>
    %218 = arith.addf %216, %217 : vector<1x128xf32>
    %219 = arith.index_cast %c5_i32 : i32 to index
    %c0_71 = arith.constant 0 : index
    %220 = vector.load %arg7[%219, %c0_71] : memref<8x128xf32, #tpu.memory_space<vmem>>, vector<1x128xf32>
    tpu.vector_store %arg7[%219, %c0_71], %218 {strides = array<i32>} : memref<8x128xf32, #tpu.memory_space<vmem>>, vector<1x128xf32>,
    %c6_i32 = arith.constant 6 : i32
    %221 = arith.index_cast %c6_i32 : i32 to index
    %c0_72 = arith.constant 0 : index
    %222 = vector.load %arg8[%221, %c0_72] : memref<8x384xf32, #tpu.memory_space<vmem>>, vector<1x384xf32>
    %223 = arith.truncf %218 : vector<1x128xf32> to vector<1x128xbf16>
    %c0_73 = arith.constant 0 : index
    %c0_74 = arith.constant 0 : index
    %224 = vector.load %arg3[%c0_73, %c0_74] : memref<128x384xbf16, #tpu.memory_space<vmem>>, vector<128x384xbf16>
    %cst_75 = arith.constant dense<0.000000e+00> : vector<1x384xf32>
    %225 = tpu.matmul %223, %224, %cst_75 {dimension_numbers = #tpu.dot_dimension_numbers<[1], [0], [0], [1], [0, 0, 1, 1], [], []>} : vector<1x128xbf16>, vector<128x384xbf16>, vector<1x384xf32> -> vector<1x384xf32>
    %226 = vector.extract_strided_slice %222 {offsets = [0, 0], sizes = [1, 128], strides = [1, 1]} : vector<1x384xf32> to vector<1x128xf32>
    %227 = vector.extract_strided_slice %225 {offsets = [0, 0], sizes = [1, 128], strides = [1, 1]} : vector<1x384xf32> to vector<1x128xf32>
    %228 = arith.addf %226, %227 : vector<1x128xf32>
    %229 = arith.negf %228 : vector<1x128xf32>
    %230 = math.exp %229 : vector<1x128xf32>
    %cst_76 = arith.constant 1.000000e+00 : f32
    %231 = vector.broadcast %cst_76 : f32 to vector<1x128xf32>
    %232 = arith.addf %231, %230 : vector<1x128xf32>
    %233 = arith.divf %231, %232 : vector<1x128xf32>
    %234 = vector.extract_strided_slice %222 {offsets = [0, 128], sizes = [1, 128], strides = [1, 1]} : vector<1x384xf32> to vector<1x128xf32>
    %235 = vector.extract_strided_slice %225 {offsets = [0, 128], sizes = [1, 128], strides = [1, 1]} : vector<1x384xf32> to vector<1x128xf32>
    %236 = arith.addf %234, %235 : vector<1x128xf32>
    %237 = arith.negf %236 : vector<1x128xf32>
    %238 = math.exp %237 : vector<1x128xf32>
    %cst_77 = arith.constant 1.000000e+00 : f32
    %239 = vector.broadcast %cst_77 : f32 to vector<1x128xf32>
    %240 = arith.addf %239, %238 : vector<1x128xf32>
    %241 = arith.divf %239, %240 : vector<1x128xf32>
    %242 = vector.extract_strided_slice %222 {offsets = [0, 256], sizes = [1, 128], strides = [1, 1]} : vector<1x384xf32> to vector<1x128xf32>
    %243 = vector.extract_strided_slice %225 {offsets = [0, 256], sizes = [1, 128], strides = [1, 1]} : vector<1x384xf32> to vector<1x128xf32>
    %c0_78 = arith.constant 0 : index
    %c0_79 = arith.constant 0 : index
    %244 = vector.load %arg5[%c0_78, %c0_79] : memref<1x128xf32, #tpu.memory_space<vmem>>, vector<1x128xf32>
    %245 = arith.addf %243, %244 : vector<1x128xf32>
    %246 = arith.mulf %233, %245 : vector<1x128xf32>
    %247 = arith.addf %242, %246 : vector<1x128xf32>
    %248 = math.tanh %247 : vector<1x128xf32>
    %cst_80 = arith.constant 1.000000e+00 : f32
    %249 = vector.broadcast %cst_80 : f32 to vector<1x128xf32>
    %250 = arith.subf %249, %241 : vector<1x128xf32>
    %251 = arith.mulf %250, %248 : vector<1x128xf32>
    %252 = arith.mulf %241, %218 : vector<1x128xf32>
    %253 = arith.addf %251, %252 : vector<1x128xf32>
    %254 = arith.index_cast %c6_i32 : i32 to index
    %c0_81 = arith.constant 0 : index
    %255 = vector.load %arg7[%254, %c0_81] : memref<8x128xf32, #tpu.memory_space<vmem>>, vector<1x128xf32>
    tpu.vector_store %arg7[%254, %c0_81], %253 {strides = array<i32>} : memref<8x128xf32, #tpu.memory_space<vmem>>, vector<1x128xf32>,
    %c7_i32 = arith.constant 7 : i32
    %256 = arith.index_cast %c7_i32 : i32 to index
    %c0_82 = arith.constant 0 : index
    %257 = vector.load %arg8[%256, %c0_82] : memref<8x384xf32, #tpu.memory_space<vmem>>, vector<1x384xf32>
    %258 = arith.truncf %253 : vector<1x128xf32> to vector<1x128xbf16>
    %c0_83 = arith.constant 0 : index
    %c0_84 = arith.constant 0 : index
    %259 = vector.load %arg3[%c0_83, %c0_84] : memref<128x384xbf16, #tpu.memory_space<vmem>>, vector<128x384xbf16>
    %cst_85 = arith.constant dense<0.000000e+00> : vector<1x384xf32>
    %260 = tpu.matmul %258, %259, %cst_85 {dimension_numbers = #tpu.dot_dimension_numbers<[1], [0], [0], [1], [0, 0, 1, 1], [], []>} : vector<1x128xbf16>, vector<128x384xbf16>, vector<1x384xf32> -> vector<1x384xf32>
    %261 = vector.extract_strided_slice %257 {offsets = [0, 0], sizes = [1, 128], strides = [1, 1]} : vector<1x384xf32> to vector<1x128xf32>
    %262 = vector.extract_strided_slice %260 {offsets = [0, 0], sizes = [1, 128], strides = [1, 1]} : vector<1x384xf32> to vector<1x128xf32>
    %263 = arith.addf %261, %262 : vector<1x128xf32>
    %264 = arith.negf %263 : vector<1x128xf32>
    %265 = math.exp %264 : vector<1x128xf32>
    %cst_86 = arith.constant 1.000000e+00 : f32
    %266 = vector.broadcast %cst_86 : f32 to vector<1x128xf32>
    %267 = arith.addf %266, %265 : vector<1x128xf32>
    %268 = arith.divf %266, %267 : vector<1x128xf32>
    %269 = vector.extract_strided_slice %257 {offsets = [0, 128], sizes = [1, 128], strides = [1, 1]} : vector<1x384xf32> to vector<1x128xf32>
    %270 = vector.extract_strided_slice %260 {offsets = [0, 128], sizes = [1, 128], strides = [1, 1]} : vector<1x384xf32> to vector<1x128xf32>
    %271 = arith.addf %269, %270 : vector<1x128xf32>
    %272 = arith.negf %271 : vector<1x128xf32>
    %273 = math.exp %272 : vector<1x128xf32>
    %cst_87 = arith.constant 1.000000e+00 : f32
    %274 = vector.broadcast %cst_87 : f32 to vector<1x128xf32>
    %275 = arith.addf %274, %273 : vector<1x128xf32>
    %276 = arith.divf %274, %275 : vector<1x128xf32>
    %277 = vector.extract_strided_slice %257 {offsets = [0, 256], sizes = [1, 128], strides = [1, 1]} : vector<1x384xf32> to vector<1x128xf32>
    %278 = vector.extract_strided_slice %260 {offsets = [0, 256], sizes = [1, 128], strides = [1, 1]} : vector<1x384xf32> to vector<1x128xf32>
    %c0_88 = arith.constant 0 : index
    %c0_89 = arith.constant 0 : index
    %279 = vector.load %arg5[%c0_88, %c0_89] : memref<1x128xf32, #tpu.memory_space<vmem>>, vector<1x128xf32>
    %280 = arith.addf %278, %279 : vector<1x128xf32>
    %281 = arith.mulf %268, %280 : vector<1x128xf32>
    %282 = arith.addf %277, %281 : vector<1x128xf32>
    %283 = math.tanh %282 : vector<1x128xf32>
    %cst_90 = arith.constant 1.000000e+00 : f32
    %284 = vector.broadcast %cst_90 : f32 to vector<1x128xf32>
    %285 = arith.subf %284, %276 : vector<1x128xf32>
    %286 = arith.mulf %285, %283 : vector<1x128xf32>
    %287 = arith.mulf %276, %253 : vector<1x128xf32>
    %288 = arith.addf %286, %287 : vector<1x128xf32>
    %289 = arith.index_cast %c7_i32 : i32 to index
    %c0_91 = arith.constant 0 : index
    %290 = vector.load %arg7[%289, %c0_91] : memref<8x128xf32, #tpu.memory_space<vmem>>, vector<1x128xf32>
    tpu.vector_store %arg7[%289, %c0_91], %288 {strides = array<i32>} : memref<8x128xf32, #tpu.memory_space<vmem>>, vector<1x128xf32>,
    %c8_i32 = arith.constant 8 : i32
    return
  }
  func.func @transform_0(%arg0: i32) -> (i32, i32) {
    %c0_i32 = arith.constant 0 : i32
    %c0_i32_0 = arith.constant 0 : i32
    %c0_i32_1 = arith.constant 0 : i32
    return %c0_i32, %c0_i32_0 : i32, i32
  }
  func.func @transform_1(%arg0: i32) -> (i32, i32) {
    %c0_i32 = arith.constant 0 : i32
    %c0_i32_0 = arith.constant 0 : i32
    %c0_i32_1 = arith.constant 0 : i32
    return %c0_i32, %c0_i32_0 : i32, i32
  }
  func.func @transform_2(%arg0: i32) -> (i32, i32) {
    %c0_i32 = arith.constant 0 : i32
    %c0_i32_0 = arith.constant 0 : i32
    %c0_i32_1 = arith.constant 0 : i32
    return %c0_i32, %c0_i32_0 : i32, i32
  }
  func.func @transform_3(%arg0: i32) -> (i32, i32) {
    %c0_i32 = arith.constant 0 : i32
    %c0_i32_0 = arith.constant 0 : i32
    %c0_i32_1 = arith.constant 0 : i32
    return %c0_i32, %c0_i32_0 : i32, i32
  }
  func.func @transform_4(%arg0: i32) -> (i32, i32) {
    %c0_i32 = arith.constant 0 : i32
    %c0_i32_0 = arith.constant 0 : i32
    %c0_i32_1 = arith.constant 0 : i32
    return %c0_i32, %c0_i32_0 : i32, i32
  }
  func.func @transform_5(%arg0: i32) -> (i32, i32) {
    %c0_i32 = arith.constant 0 : i32
    %c0_i32_0 = arith.constant 0 : i32
    %c0_i32_1 = arith.constant 0 : i32
    return %c0_i32, %c0_i32_0 : i32, i32
  }
  func.func @transform_6(%arg0: i32) -> (i32, i32) {
    %c0_i32 = arith.constant 0 : i32
    %c0_i32_0 = arith.constant 0 : i32
    %c0_i32_1 = arith.constant 0 : i32
    return %c0_i32, %c0_i32_0 : i32, i32
  }
}

</mosaic_0001>

<bundles_post_ra>
// kernel: encoder_rnn_forward.1
= control target key start
LH: loop header
LB: loop body
LE: loop exit
PB: predicated region body
PF: predicated region fallthrough
CT: control target
= control target key end

     0   :  { %11 = vsyncpa [#allocation4], 0  ;;  %s3787_s0 = inlined_call_operand.vmem [shape: f32[8,128], index: 0, kind: input, shape index: {}]   ;;  %s3788_s1 = inlined_call_operand.hbm [shape: bf16[128,384], index: 1, kind: input, shape index: {}]   ;;  %s3789_s2 = inlined_call_operand.hbm [shape: bf16[128,384], index: 2, kind: input, shape index: {}]   ;;  %s3790_s3 = inlined_call_operand.vmem [shape: f32[1,384], index: 3, kind: input, shape index: {}]   ;;  %s3791_s4 = inlined_call_operand.vmem [shape: f32[1,128], index: 4, kind: input, shape index: {}]   ;;  %s3792_s5 = inlined_call_operand.vmem [shape: f32[1,128], index: 5, kind: input, shape index: {}]   ;;  %s3793_s6 = inlined_call_operand.vmem [shape: f32[8,128], index: 6, kind: output, shape index: {}]  }
   0x1   :  { %s19_s23 = sshll.u32 %s3788_s1, 4  ;;  %s20_s23 = int_to_ptr.hbm [resolvable:$true] %s19_s23 }
   0x2   :  { %12 = vsyncpa [#allocation6], 0  ;;  %s3563_s24 = smov [#allocation3]   ;;  %s32_s28 = sshll.u32 %s3789_s2, 4  ;;  %s33_s28 = int_to_ptr.hbm [resolvable:$true] %s32_s28 }
   0x3   :  { %s21_s25 = sshll.u32 %s3563_s24, 4  ;;  %s3564_s29 = smov 192   ;;  %s22_s25 = int_to_ptr.vmem [resolvable:$true] %s21_s25 }
   0x4   :  { %s3565_s30 = smov 12   ;;  %s3566_s7 = smov [#allocation5]  }
   0x5   :  { %27 = dma.hbm_to_vmem [thread:$0]  %s20_s23, 3072, %s22_s25, [#allocation4], %s3564_s29, %s3564_s29, %s3565_s30  }
   0x6   :  { %s34_s8 = sshll.u32 %s3566_s7, 4  ;;  %s35_s8 = int_to_ptr.vmem [resolvable:$true] %s34_s8 }
   0x7   :  { %40 = dma.hbm_to_vmem [thread:$0]  %s33_s28, 3072, %s35_s8, [#allocation6], %s3564_s29, %s3564_s29, %s3565_s30  }
   0x8   :  { %3559 = dma.done.wait [#allocation4], 3072  }
   0x9   :  { %3560 = vsyncadd [#allocation4], 4294964224 }
   0xa   :  { %3561 = dma.done.wait [#allocation6], 3072  }
   0xb   :  { %3562 = vsyncadd [#allocation6], 4294964224  ;;  %v2416_v0 = vld [vmem:[#allocation3 + $0xa8] sm:$0xf]  ;;  %v3232_v1 = vld [vmem:[#allocation3 + $0xb0] sm:$0xf0] }
   0xc   :  { %v2424_v2 = vld [vmem:[#allocation3 + $0xb0] sm:$0xf]  ;;  %v2417_v3 = vor.u32 %v3232_v1, %v2416_v0  ;;  %v3233_v4 = vld [vmem:[#allocation3 + $0xb8] sm:$0xf0]  ;;  %v3231_v5 = vld [vmem:[#allocation3 + $0xac] sm:$0xf] }
   0xd   :  { %v2418_v6 = vld [vmem:[#allocation3 + $0xb4] sm:$0xf0]  ;;  %v2425_v7 = vor.u32 %v3233_v4, %v2424_v2  ;;  %v2404_v9 = vld [vmem:[#allocation3 + $0x90] sm:$0xf]  ;;  %v3229_v10 = vld [vmem:[#allocation3 + $0x98] sm:$0xf0] }
   0xe   :  { %v2421_v8 = vor.u32 %v3231_v5, %v2418_v6  ;;  %v2412_v11 = vld [vmem:[#allocation3 + $0x98] sm:$0xf]  ;;  %226 = vmatpush.bf16.msra.mxu0 %v2417_v3  ;;  %v2405_v12 = vor.u32 %v3229_v10, %v2404_v9  ;;  %v3230_v13 = vld [vmem:[#allocation3 + $0xa0] sm:$0xf0]  ;;  %v3228_v14 = vld [vmem:[#allocation3 + $0x94] sm:$0xf] }
   0xf   :  { %v2406_v15 = vld [vmem:[#allocation3 + $0x9c] sm:$0xf0]  ;;  %252 = vmatpush.bf16.msra.mxu2 %v2425_v7  ;;  %v2413_v16 = vor.u32 %v3230_v13, %v2412_v11  ;;  %v2512_v18 = vld [vmem:[#allocation5 + $0xa8] sm:$0xf]  ;;  %v3256_v19 = vld [vmem:[#allocation5 + $0xb0] sm:$0xf0] }
  0x10   :  { %239 = vmatpush.bf16.msra.mxu1 %v2421_v8  ;;  %v2409_v17 = vor.u32 %v3228_v14, %v2406_v15  ;;  %v2392_v20 = vld [vmem:[#allocation3 + $0x78] sm:$0xf]  ;;  %v2513_v21 = vor.u32 %v3256_v19, %v2512_v18  ;;  %v3226_v22 = vld [vmem:[#allocation3 + $0x80] sm:$0xf0]  ;;  %v2400_v23 = vld [vmem:[#allocation3 + $0x80] sm:$0xf] }
  0x11   :  { %v3227_v24 = vld [vmem:[#allocation3 + $0x88] sm:$0xf0]  ;;  %v3225_v25 = vld [vmem:[#allocation3 + $0x7c] sm:$0xf]  ;;  %v2394_v26 = vld [vmem:[#allocation3 + $0x84] sm:$0xf0]  ;;  %v2393_v28 = vor.u32 %v3226_v22, %v2392_v20 }
  0x12   :  { %v2500_v27 = vld [vmem:[#allocation5 + $0x90] sm:$0xf]  ;;  %227 = vmatpush.bf16.msra.mxu0 %v2405_v12  ;;  %431 = vmatpush.bf16.msra.mxu3 %v2513_v21  ;;  %v3253_v29 = vld [vmem:[#allocation5 + $0x98] sm:$0xf0]  ;;  %v2380_v30 = vld [vmem:[#allocation3 + $0x60] sm:$0xf]  ;;  %v2401_v32 = vor.u32 %v3227_v24, %v2400_v23  ;;  %v2397_v33 = vor.u32 %v3225_v25, %v2394_v26 }
  0x13   :  { %v3223_v31 = vld [vmem:[#allocation3 + $0x68] sm:$0xf0]  ;;  %253 = vmatpush.bf16.msra.mxu2 %v2413_v16  ;;  %v2501_v34 = vor.u32 %v3253_v29, %v2500_v27  ;;  %v2388_v35 = vld [vmem:[#allocation3 + $0x68] sm:$0xf]  ;;  %v3224_v36 = vld [vmem:[#allocation3 + $0x70] sm:$0xf0] }
  0x14   :  { %240 = vmatpush.bf16.msra.mxu1 %v2409_v17  ;;  %v3222_v37 = vld [vmem:[#allocation3 + $0x64] sm:$0xf]  ;;  %v2382_v38 = vld [vmem:[#allocation3 + $0x6c] sm:$0xf0]  ;;  %v2488_v39 = vld [vmem:[#allocation5 + $0x78] sm:$0xf]  ;;  %v2381_v41 = vor.u32 %v3223_v31, %v2380_v30  ;;  %v2389_v45 = vor.u32 %v3224_v36, %v2388_v35 }
  0x15   :  { %v3250_v40 = vld [vmem:[#allocation5 + $0x80] sm:$0xf0]  ;;  %v2368_v43 = vld [vmem:[#allocation3 + $0x48] sm:$0xf]  ;;  %v3220_v44 = vld [vmem:[#allocation3 + $0x50] sm:$0xf0]  ;;  %v2385_v46 = vor.u32 %v3222_v37, %v2382_v38 }
  0x16   :  { %228 = vmatpush.bf16.msra.mxu0 %v2393_v28  ;;  %432 = vmatpush.bf16.msra.mxu3 %v2501_v34  ;;  %v2489_v42 = vor.u32 %v3250_v40, %v2488_v39  ;;  %v2376_v47 = vld [vmem:[#allocation3 + $0x50] sm:$0xf]  ;;  %v2476_v48 = vld [vmem:[#allocation5 + $0x60] sm:$0xf]  ;;  %v3247_v49 = vld [vmem:[#allocation5 + $0x68] sm:$0xf0]  ;;  %v2369_v53 = vor.u32 %v3220_v44, %v2368_v43 }
  0x17   :  { %254 = vmatpush.bf16.msra.mxu2 %v2401_v32  ;;  %v3221_v50 = vld [vmem:[#allocation3 + $0x58] sm:$0xf0]  ;;  %v3219_v51 = vld [vmem:[#allocation3 + $0x4c] sm:$0xf]  ;;  %v2370_v52 = vld [vmem:[#allocation3 + $0x54] sm:$0xf0]  ;;  %v2477_v54 = vor.u32 %v3247_v49, %v2476_v48 }
  0x18   :  { %241 = vmatpush.bf16.msra.mxu1 %v2397_v33  ;;  %v2356_v55 = vld [vmem:[#allocation3 + $0x30] sm:$0xf]  ;;  %v3217_v56 = vld [vmem:[#allocation3 + $0x38] sm:$0xf0]  ;;  %v2377_v57 = vor.u32 %v3221_v50, %v2376_v47  ;;  %v2373_v58 = vor.u32 %v3219_v51, %v2370_v52  ;;  %v2364_v59 = vld [vmem:[#allocation3 + $0x38] sm:$0xf] }
  0x19   :  { %v2464_v60 = vld [vmem:[#allocation5 + $0x48] sm:$0xf]  ;;  %v3244_v61 = vld [vmem:[#allocation5 + $0x50] sm:$0xf0]  ;;  %v3218_v62 = vld [vmem:[#allocation3 + $0x40] sm:$0xf0]  ;;  %v2357_v1 = vor.u32 %v3217_v56, %v2356_v55 }
  0x1a   :  { %229 = vmatpush.bf16.msra.mxu0 %v2381_v41  ;;  %433 = vmatpush.bf16.msra.mxu3 %v2489_v42  ;;  %v3216_v63 = vld [vmem:[#allocation3 + $0x34] sm:$0xf]  ;;  %v2358_v0 = vld [vmem:[#allocation3 + $0x3c] sm:$0xf0]  ;;  %v2465_v2 = vor.u32 %v3244_v61, %v2464_v60  ;;  %v2344_v3 = vld [vmem:[#allocation3 + $0x18] sm:$0xf]  ;;  %v2365_v5 = vor.u32 %v3218_v62, %v2364_v59 }
  0x1b   :  { %255 = vmatpush.bf16.msra.mxu2 %v2389_v45  ;;  %v3214_v4 = vld [vmem:[#allocation3 + $0x20] sm:$0xf0]  ;;  %v2361_v6 = vor.u32 %v3216_v63, %v2358_v0  ;;  %v2352_v7 = vld [vmem:[#allocation3 + $0x20] sm:$0xf]  ;;  %v2452_v8 = vld [vmem:[#allocation5 + $0x30] sm:$0xf] }
  0x1c   :  { %242 = vmatpush.bf16.msra.mxu1 %v2385_v46  ;;  %v3241_v9 = vld [vmem:[#allocation5 + $0x38] sm:$0xf0]  ;;  %v3215_v10 = vld [vmem:[#allocation3 + $0x28] sm:$0xf0]  ;;  %v2346_v12 = vld [vmem:[#allocation3 + $0x24] sm:$0xf0]  ;;  %v2345_v13 = vor.u32 %v3214_v4, %v2344_v3 }
  0x1d   :  { %v3213_v11 = vld [vmem:[#allocation3 + $0x1c] sm:$0xf]  ;;  %v2453_v14 = vor.u32 %v3241_v9, %v2452_v8  ;;  %v2332_v15 = vld [vmem:[#allocation3] sm:$0xf]  ;;  %v3211_v16 = vld [vmem:[#allocation3 + $0x8] sm:$0xf0]  ;;  %v2353_v17 = vor.u32 %v3215_v10, %v2352_v7 }
  0x1e   :  { %230 = vmatpush.bf16.msra.mxu0 %v2369_v53  ;;  %434 = vmatpush.bf16.msra.mxu3 %v2477_v54  ;;  %v2349_v18 = vor.u32 %v3213_v11, %v2346_v12  ;;  %v2340_v19 = vld [vmem:[#allocation3 + $0x8] sm:$0xf]  ;;  %v2440_v20 = vld [vmem:[#allocation5 + $0x18] sm:$0xf]  ;;  %v3238_v21 = vld [vmem:[#allocation5 + $0x20] sm:$0xf0]  ;;  %v2333_v27 = vor.u32 %v3211_v16, %v2332_v15 }
  0x1f   :  { %256 = vmatpush.bf16.msra.mxu2 %v2377_v57  ;;  %v3212_v22 = vld [vmem:[#allocation3 + $0x10] sm:$0xf0]  ;;  %v3255_v23 = vld [vmem:[#allocation5 + $0xac] sm:$0xf]  ;;  %v2514_v24 = vld [vmem:[#allocation5 + $0xb4] sm:$0xf0]  ;;  %v2441_v28 = vor.u32 %v3238_v21, %v2440_v20 }
  0x20   :  { %243 = vmatpush.bf16.msra.mxu1 %v2373_v58  ;;  %v3210_v25 = vld [vmem:[#allocation3 + $0x4] sm:$0xf]  ;;  %v2334_v26 = vld [vmem:[#allocation3 + $0xc] sm:$0xf0]  ;;  %v3257_v30 = vld [vmem:[#allocation5 + $0xb8] sm:$0xf0]  ;;  %v2341_v31 = vor.u32 %v3212_v22, %v2340_v19  ;;  %v2517_v32 = vor.u32 %v3255_v23, %v2514_v24 }
  0x21   :  { %v2520_v29 = vld [vmem:[#allocation5 + $0xb0] sm:$0xf]  ;;  %v56_v33 = vld [vmem:[%s3787_s0] sm:$0xff]  ;;  %v2428_v34 = vld [vmem:[#allocation5] sm:$0xf]  ;;  %v2337_v36 = vor.u32 %v3210_v25, %v2334_v26 }
  0x22   :  { %231 = vmatpush.bf16.msra.mxu0 %v2357_v1  ;;  %435 = vmatpush.bf16.msra.mxu3 %v2465_v2  ;;  %v3235_v35 = vld [vmem:[#allocation5 + $0x8] sm:$0xf0]  ;;  %v3252_v37 = vld [vmem:[#allocation5 + $0x94] sm:$0xf]  ;;  %v2502_v38 = vld [vmem:[#allocation5 + $0x9c] sm:$0xf0]  ;;  %v2521_v39 = vor.u32 %v3257_v30, %v2520_v29  ;;  %v57_v40 = vpack.c.bf16 %v56_v33, %v56_v33 }
  0x23   :  { %257 = vmatpush.bf16.msra.mxu2 %v2365_v5  ;;  %v2429_v41 = vor.u32 %v3235_v35, %v2428_v34  ;;  %v3615_v42 = vld [vmem:[%s3792_s5] sm:$0x1]  ;;  %v2508_v43 = vld [vmem:[#allocation5 + $0x98] sm:$0xf]  ;;  %v3254_v44 = vld [vmem:[#allocation5 + $0xa0] sm:$0xf0]  ;;  %v2505_v45 = vor.u32 %v3252_v37, %v2502_v38 }
  0x24   :  { %244 = vmatpush.bf16.msra.mxu1 %v2361_v6  ;;  %v3249_v46 = vld [vmem:[#allocation5 + $0x7c] sm:$0xf]  ;;  %v2490_v47 = vld [vmem:[#allocation5 + $0x84] sm:$0xf0]  ;;  %v270_v48 = vpack.c.bf16 %v3615_v42, %v3615_v42  ;;  %v2509_v49 = vor.u32 %v3254_v44, %v2508_v43  ;;  %v2496_v50 = vld [vmem:[#allocation5 + $0x80] sm:$0xf] }
  0x25   :  { %v3251_v51 = vld [vmem:[#allocation5 + $0x88] sm:$0xf0]  ;;  %v2493_v52 = vor.u32 %v3249_v46, %v2490_v47  ;;  %v3246_v53 = vld [vmem:[#allocation5 + $0x64] sm:$0xf]  ;;  %v2478_v54 = vld [vmem:[#allocation5 + $0x6c] sm:$0xf0] }
  0x26   :  { %232 = vmatpush.bf16.msra.mxu0 %v2345_v13  ;;  %436 = vmatpush.bf16.msra.mxu3 %v2453_v14  ;;  %v2497_v55 = vor.u32 %v3251_v51, %v2496_v50  ;;  %v2484_v56 = vld [vmem:[#allocation5 + $0x68] sm:$0xf]  ;;  %v3248_v57 = vld [vmem:[#allocation5 + $0x70] sm:$0xf0]  ;;  %v2481_v58 = vor.u32 %v3246_v53, %v2478_v54  ;;  %v3243_v59 = vld [vmem:[#allocation5 + $0x4c] sm:$0xf] }
  0x27   :  { %258 = vmatpush.bf16.msra.mxu2 %v2353_v17  ;;  %v2466_v60 = vld [vmem:[#allocation5 + $0x54] sm:$0xf0]  ;;  %v2485_v61 = vor.u32 %v3248_v57, %v2484_v56  ;;  %v2472_v62 = vld [vmem:[#allocation5 + $0x50] sm:$0xf]  ;;  %v3245_v63 = vld [vmem:[#allocation5 + $0x58] sm:$0xf0] }
  0x28   :  { %245 = vmatpush.bf16.msra.mxu1 %v2349_v18  ;;  %v2469_v0 = vor.u32 %v3243_v59, %v2466_v60  ;;  %v3240_v1 = vld [vmem:[#allocation5 + $0x34] sm:$0xf]  ;;  %v2454_v2 = vld [vmem:[#allocation5 + $0x3c] sm:$0xf0]  ;;  %v2473_v3 = vor.u32 %v3245_v63, %v2472_v62  ;;  %v2460_v4 = vld [vmem:[#allocation5 + $0x38] sm:$0xf] }
  0x29   :  { %v3242_v5 = vld [vmem:[#allocation5 + $0x40] sm:$0xf0]  ;;  %v2457_v6 = vor.u32 %v3240_v1, %v2454_v2  ;;  %v3237_v7 = vld [vmem:[#allocation5 + $0x1c] sm:$0xf]  ;;  %v2442_v8 = vld [vmem:[#allocation5 + $0x24] sm:$0xf0] }
  0x2a   :  { %233 = vmatpush.bf16.msra.mxu0 %v2333_v27  ;;  %437 = vmatpush.bf16.msra.mxu3 %v2441_v28  ;;  %v2461_v9 = vor.u32 %v3242_v5, %v2460_v4  ;;  %v2448_v10 = vld [vmem:[#allocation5 + $0x20] sm:$0xf]  ;;  %v3239_v11 = vld [vmem:[#allocation5 + $0x28] sm:$0xf0]  ;;  %v2445_v12 = vor.u32 %v3237_v7, %v2442_v8  ;;  %v3234_v13 = vld [vmem:[#allocation5 + $0x4] sm:$0xf] }
  0x2b   :  { %259 = vmatpush.bf16.msra.mxu2 %v2341_v31  ;;  %v2430_v14 = vld [vmem:[#allocation5 + $0xc] sm:$0xf0]  ;;  %v2449_v15 = vor.u32 %v3239_v11, %v2448_v10  ;;  %v2436_v16 = vld [vmem:[#allocation5 + $0x8] sm:$0xf]  ;;  %v3236_v17 = vld [vmem:[#allocation5 + $0x10] sm:$0xf0] }
  0x2c   :  { %246 = vmatpush.bf16.msra.mxu1 %v2337_v36  ;;  %v2433_v18 = vor.u32 %v3234_v13, %v2430_v14  ;;  %v2437_v19 = vor.u32 %v3236_v17, %v2436_v16  ;;  %v90_v20 = vld [vmem:[%s3790_s3] sm:$0x7]  ;;  %v3280_v29 = vld [vmem:[#allocation5 + $0xb0] sm:$0xf0]  ;;  %v3279_v31 = vld [vmem:[#allocation5 + $0xac] sm:$0xf] }
  0x2d   :  { %234 = vmatmul.bf16.vlgmr.msra.gmra.mxu0 %v57_v40  ;;  %v92_v21 = vperm.slane %v90_v20, 0  ;;  %v93_v22 = vperm.slane %v90_v20, 1  ;;  %v94_v27 = vperm.slane %v90_v20, 2  ;;  %v2610_v28 = vld [vmem:[#allocation5 + $0xa8] sm:$0xf] }
  0x2e   :  { %444 = vmatpush.bf16.msrb.mxu0 %v2517_v32  ;;  %260 = vmatmul.bf16.vlgmr.msra.gmra.mxu2 %v57_v40  ;;  %v2611_v30 = vor.u32 %v3280_v29, %v2610_v28  ;;  %v2612_v32 = vld [vmem:[#allocation5 + $0xb4] sm:$0xf0]  ;;  %v2618_v33 = vld [vmem:[#allocation5 + $0xb0] sm:$0xf]  ;;  %v3281_v35 = vld [vmem:[#allocation5 + $0xb8] sm:$0xf0] }
  0x2f   :  { %438 = vmatpush.bf16.msra.mxu3 %v2429_v41  ;;  %247 = vmatmul.bf16.vlgmr.msra.gmra.mxu1 %v57_v40  ;;  %v2615_v34 = vor.u32 %v3279_v31, %v2612_v32  ;;  %v2619_v36 = vor.u32 %v3281_v35, %v2618_v33  ;;  %v2598_v38 = vld [vmem:[#allocation5 + $0x90] sm:$0xf]  ;;  %v3276_v40 = vld [vmem:[#allocation5 + $0x94] sm:$0xf]  ;;  %v2606_v46 = vld [vmem:[#allocation5 + $0x98] sm:$0xf] }
  0x30   :  { %457 = vmatpush.bf16.msrb.mxu1 %v2521_v39  ;;  %688 = vmatpush.bf16.msrb.mxu2 %v2611_v30  ;;  %v3277_v39 = vld [vmem:[#allocation5 + $0x98] sm:$0xf0]  ;;  %v3278_v47 = vld [vmem:[#allocation5 + $0xa0] sm:$0xf0]  ;;  %v2588_v56 = vld [vmem:[#allocation5 + $0x84] sm:$0xf0] }
  0x31   :  { %v2599_v44 = vor.u32 %v3277_v39, %v2598_v38  ;;  %v3274_v53 = vld [vmem:[#allocation5 + $0x80] sm:$0xf0]  ;;  %v3273_v54 = vld [vmem:[#allocation5 + $0x7c] sm:$0xf]  ;;  %v2594_v57 = vld [vmem:[#allocation5 + $0x80] sm:$0xf] }
  0x32   :  { %445 = vmatpush.bf16.msrb.mxu0 %v2505_v45  ;;  %439 = vmatmul.bf16.vlgmr.msra.gmra.mxu3 %v270_v48  ;;  %v2600_v45 = vld [vmem:[#allocation5 + $0x9c] sm:$0xf0]  ;;  %v2591_v59 = vor.u32 %v3273_v54, %v2588_v56  ;;  %v3271_v63 = vld [vmem:[#allocation5 + $0x68] sm:$0xf0]  ;;  %v2576_v2 = vld [vmem:[#allocation5 + $0x6c] sm:$0xf0] }
  0x33   :  { %701 = vmatpush.bf16.msrb.mxu3 %v2615_v34  ;;  %v2574_v62 = vld [vmem:[#allocation5 + $0x60] sm:$0xf]  ;;  %v3272_v4 = vld [vmem:[#allocation5 + $0x70] sm:$0xf0]  ;;  %v2562_v10 = vld [vmem:[#allocation5 + $0x48] sm:$0xf] }
  0x34   :  { %458 = vmatpush.bf16.msrb.mxu1 %v2509_v49  ;;  %v2607_v49 = vor.u32 %v3278_v47, %v2606_v46  ;;  %689 = vmatpush.bf16.msrb.mxu2 %v2599_v44  ;;  %v2575_v1 = vor.u32 %v3271_v63, %v2574_v62  ;;  %v3268_v11 = vld [vmem:[#allocation5 + $0x50] sm:$0xf0]  ;;  %v2570_v16 = vld [vmem:[#allocation5 + $0x50] sm:$0xf]  ;;  %v2538_v29 = vld [vmem:[#allocation5 + $0x18] sm:$0xf] }
  0x35   :  { %v2563_v14 = vor.u32 %v3268_v11, %v2562_v10  ;;  %v2550_v20 = vld [vmem:[#allocation5 + $0x30] sm:$0xf]  ;;  %v3262_v30 = vld [vmem:[#allocation5 + $0x20] sm:$0xf0]  ;;  %v3261_v31 = vld [vmem:[#allocation5 + $0x1c] sm:$0xf] }
  0x36   :  { %446 = vmatpush.bf16.msrb.mxu0 %v2493_v52  ;;  %v2586_v52 = vld [vmem:[#allocation5 + $0x78] sm:$0xf]  ;;  %v2540_v32 = vld [vmem:[#allocation5 + $0x24] sm:$0xf0]  ;;  %v2546_v33 = vld [vmem:[#allocation5 + $0x20] sm:$0xf]  ;;  %v2539_v35 = vor.u32 %v3262_v30, %v2538_v29 }
  0x37   :  { %v3263_v34 = vld [vmem:[#allocation5 + $0x28] sm:$0xf0]  ;;  %v2528_v44 = vld [vmem:[#allocation5 + $0xc] sm:$0xf0]  ;;  %v2534_v47 = vld [vmem:[#allocation5 + $0x8] sm:$0xf] }
  0x38   :  { %459 = vmatpush.bf16.msrb.mxu1 %v2497_v55  ;;  %v2587_v55 = vor.u32 %v3274_v53, %v2586_v52  ;;  %v3259_v38 = vld [vmem:[#allocation5 + $0x8] sm:$0xf0] }
  0x39   :  { %v3303_v29 = vld [vmem:[#allocation5 + $0xac] sm:$0xf] }
  0x3a   :  { %447 = vmatpush.bf16.msrb.mxu0 %v2481_v58  ;;  %v3275_v58 = vld [vmem:[#allocation5 + $0x88] sm:$0xf0]  ;;  %690 = vmatpush.bf16.msrb.mxu2 %v2587_v55 }
  0x3b   :  { %v2595_v60 = vor.u32 %v3275_v58, %v2594_v57 }
  0x3c   :  { %460 = vmatpush.bf16.msrb.mxu1 %v2485_v61 }
  0x3e   :  { %448 = vmatpush.bf16.msrb.mxu0 %v2469_v0  ;;  %v3270_v0 = vld [vmem:[#allocation5 + $0x64] sm:$0xf]  ;;  %691 = vmatpush.bf16.msrb.mxu2 %v2575_v1 }
  0x40   :  { %461 = vmatpush.bf16.msrb.mxu1 %v2473_v3  ;;  %v2582_v3 = vld [vmem:[#allocation5 + $0x68] sm:$0xf] }
  0x41   :  { %v2583_v7 = vor.u32 %v3272_v4, %v2582_v3 }
  0x42   :  { %449 = vmatpush.bf16.msrb.mxu0 %v2457_v6  ;;  %v2579_v6 = vor.u32 %v3270_v0, %v2576_v2  ;;  %692 = vmatpush.bf16.msrb.mxu2 %v2563_v14  ;;  %v513_v0 = vld [vmem:[%s3791_s4] sm:$0x1] }
  0x44   :  { %462 = vmatpush.bf16.msrb.mxu1 %v2461_v9 }
  0x46   :  { %450 = vmatpush.bf16.msrb.mxu0 %v2445_v12  ;;  %v3267_v12 = vld [vmem:[#allocation5 + $0x4c] sm:$0xf] }
  0x48   :  { %463 = vmatpush.bf16.msrb.mxu1 %v2449_v15  ;;  %v2564_v15 = vld [vmem:[#allocation5 + $0x54] sm:$0xf0] }
  0x49   :  { %v2567_v17 = vor.u32 %v3267_v12, %v2564_v15 }
  0x4a   :  { %451 = vmatpush.bf16.msrb.mxu0 %v2433_v18  ;;  %v3269_v18 = vld [vmem:[#allocation5 + $0x58] sm:$0xf0] }
  0x4c   :  { %464 = vmatpush.bf16.msrb.mxu1 %v2437_v19  ;;  %v2571_v19 = vor.u32 %v3269_v18, %v2570_v16 }
  0x4d   :  { %452 = vmatmul.bf16.vlgmr.msrb.gmra.mxu0 %v270_v48 }
  0x4e   :  { %714 = vmatpush.bf16.msra.mxu0 %v2619_v36  ;;  %v2543_v36 = vor.u32 %v3261_v31, %v2540_v32  ;;  %v2710_v31 = vld [vmem:[#allocation5 + $0xb4] sm:$0xf0]  ;;  %v2716_v32 = vld [vmem:[#allocation5 + $0xb0] sm:$0xf] }
  0x4f   :  { %465 = vmatmul.bf16.vlgmr.msrb.gmra.mxu1 %v270_v48  ;;  %v2603_v48 = vor.u32 %v3276_v40, %v2600_v45 }
  0x51   :  { %702 = vmatpush.bf16.msrb.mxu3 %v2603_v48  ;;  %v3260_v48 = vld [vmem:[#allocation5 + $0x10] sm:$0xf0] }
  0x52   :  { %715 = vmatpush.bf16.msra.mxu0 %v2607_v49  ;;  %v3567_v49 = vmov 0.0   ;;  %v2535_v55 = vor.u32 %v3260_v48, %v2534_v47  ;;  %v3297_v47 = vld [vmem:[#allocation5 + $0x7c] sm:$0xf] }
  0x53   :  { %55 = vst [vmem:[%s3793_s6] sm:$0xff] %v3567_v49  ;;  %v2686_v49 = vld [vmem:[#allocation5 + $0x84] sm:$0xf0] }
  0x55   :  { %703 = vmatpush.bf16.msrb.mxu3 %v2591_v59 }
  0x56   :  { %716 = vmatpush.bf16.msra.mxu0 %v2595_v60 }
  0x59   :  { %704 = vmatpush.bf16.msrb.mxu3 %v2579_v6 }
  0x5a   :  { %717 = vmatpush.bf16.msra.mxu0 %v2583_v7 }
  0x5d   :  { %705 = vmatpush.bf16.msrb.mxu3 %v2567_v17 }
  0x5e   :  { %718 = vmatpush.bf16.msra.mxu0 %v2571_v19 }
  0xaa   :  { %v235_v23 = vpop.f32.mrf.mxu0 }
  0xab   :  { %v236_v24 = vadd.f32 %v235_v23, %v92_v21  ;;  %v3265_v21 = vld [vmem:[#allocation5 + $0x38] sm:$0xf0] }
  0xac   :  { %v248_v25 = vpop.f32.mrf.mxu1  ;;  %v2551_v23 = vor.u32 %v3265_v21, %v2550_v20 }
  0xad   :  { %265 = vst [vmem:[#allocation2] sm:$0xff] %v236_v24  ;;  %v249_v26 = vadd.f32 %v248_v25, %v93_v22  ;;  %v3264_v22 = vld [vmem:[#allocation5 + $0x34] sm:$0xf]  ;;  %v2552_v24 = vld [vmem:[#allocation5 + $0x3c] sm:$0xf0] }
  0xae   :  { %v2558_v25 = vld [vmem:[#allocation5 + $0x38] sm:$0xf]  ;;  %693 = vmatpush.bf16.msrb.mxu2 %v2551_v23 }
  0xaf   :  { %266 = vst [vmem:[#allocation2 + $0x8] sm:$0xff] %v249_v26  ;;  %v3266_v26 = vld [vmem:[#allocation5 + $0x40] sm:$0xf0] }
  0xb0   :  { %v2559_v28 = vor.u32 %v3266_v26, %v2558_v25 }
  0xb1   :  { %v261_v37 = vpop.f32.mrf.mxu2 }
  0xb2   :  { %v262_v41 = vadd.f32 %v261_v37, %v94_v27  ;;  %v237_v43 = vpop.f32.mrf.mxu0  ;;  %v2555_v27 = vor.u32 %v3264_v22, %v2552_v24  ;;  %v2526_v37 = vld [vmem:[#allocation5] sm:$0xf]  ;;  %719 = vmatpush.bf16.msra.mxu0 %v2559_v28  ;;  %694 = vmatpush.bf16.msrb.mxu2 %v2539_v35  ;;  %v3304_v28 = vld [vmem:[#allocation5 + $0xb0] sm:$0xf0]  ;;  %v2696_v35 = vld [vmem:[#allocation5 + $0x90] sm:$0xf] }
  0xb3   :  { %v3258_v43 = vld [vmem:[#allocation5 + $0x4] sm:$0xf] }
  0xb4   :  { %267 = vst [vmem:[#allocation2 + $0x10] sm:$0xff] %v262_v41  ;;  %v250_v50 = vpop.f32.mrf.mxu1  ;;  %706 = vmatpush.bf16.msrb.mxu3 %v2555_v27  ;;  %v2547_v41 = vor.u32 %v3263_v34, %v2546_v33  ;;  %v2531_v53 = vor.u32 %v3258_v43, %v2528_v44  ;;  %v2708_v27 = vld [vmem:[#allocation5 + $0xa8] sm:$0xf]  ;;  %v2713_v33 = vor.u32 %v3303_v29, %v2710_v31  ;;  %v3286_v29 = vld [vmem:[#allocation5 + $0x20] sm:$0xf0] }
  0xb5   :  { %v440_v51 = vpop.f32.mrf.mxu3  ;;  %v2709_v30 = vor.u32 %v3304_v28, %v2708_v27  ;;  %v2636_v27 = vld [vmem:[#allocation5 + $0x18] sm:$0xf]  ;;  %v2638_v31 = vld [vmem:[#allocation5 + $0x24] sm:$0xf0] }
  0xb6   :  { %720 = vmatpush.bf16.msra.mxu0 %v2547_v41  ;;  %v3302_v41 = vld [vmem:[#allocation5 + $0xa0] sm:$0xf0] }
  0xb7   :  { %945 = vmatpush.bf16.msra.mxu1 %v2709_v30  ;;  %v3285_v30 = vld [vmem:[#allocation5 + $0x1c] sm:$0xf] }
  0xb8   :  { %707 = vmatpush.bf16.msrb.mxu3 %v2543_v36  ;;  %v3301_v36 = vld [vmem:[#allocation5 + $0x98] sm:$0xf0] }
  0xb9   :  { %v263_v61 = vpop.f32.mrf.mxu2 }
  0xba   :  { %721 = vmatpush.bf16.msra.mxu0 %v2535_v55 }
  0xbb   :  { %v3622_v5 = vld [vmem:[#allocation2] ss:$8 sm:$0x7] }
  0xbc   :  { %v470_v8 = vadd.f32 %v440_v51, %v3622_v5  ;;  %v491_v40 = vrot.slane %v3622_v5, 1  ;;  %v2527_v51 = vor.u32 %v3259_v38, %v2526_v37  ;;  %708 = vmatpush.bf16.msrb.mxu3 %v2531_v53  ;;  %v516_v11 = vrot.slane %v3622_v5, 2  ;;  %v3300_v37 = vld [vmem:[#allocation5 + $0x94] sm:$0xf] }
  0xbd   :  { %v442_v9 = vpop.f32.mrf.mxu3  ;;  %v2697_v38 = vor.u32 %v3301_v36, %v2696_v35  ;;  %v2624_v35 = vld [vmem:[#allocation5] sm:$0xf] }
  0xbe   :  { %v2522_v13 = vmul.f32 -1.442695, %v470_v8  ;;  %695 = vmatpush.bf16.msrb.mxu2 %v2527_v51  ;;  %v3299_v51 = vld [vmem:[#allocation5 + $0x88] sm:$0xf0] }
  0xbf   :  { %946 = vmatpush.bf16.msra.mxu1 %v2697_v38 }
  0xc0   :  { %3431 = vpow2.f32 %v2522_v13 }
  0xc2   :  { %958 = vmatpush.bf16.msra.mxu2 %v2713_v33  ;;  %v2644_v33 = vld [vmem:[#allocation5 + $0x20] sm:$0xf] }
  0xc6   :  { %v3432_v39 = vpop.eup %3431 }
  0xc7   :  { %v474_v45 = vadd.f32 1.0, %v3432_v39  ;;  %v2698_v39 = vld [vmem:[#allocation5 + $0x9c] sm:$0xf0] }
  0xc8   :  { %v2701_v43 = vor.u32 %v3300_v37, %v2698_v39  ;;  %v3283_v39 = vld [vmem:[#allocation5 + $0x8] sm:$0xf0] }
  0xc9   :  { %3433 = vrcp.f32 %v474_v45  ;;  %v486_v63 = vand.u32 2147483648, %v474_v45  ;;  %v484_v2 = vand.u32 2147483647, %v474_v45  ;;  %vm480_vm1 = vweird.f32 %v474_v45 }
  0xca   :  { %v453_v46 = vpop.f32.mrf.mxu0  ;;  %959 = vmatpush.bf16.msra.mxu2 %v2701_v43  ;;  %v2632_v43 = vld [vmem:[#allocation5 + $0x8] sm:$0xf] }
  0xcb   :  { %v493_v50 = vadd.f32 %v491_v40, %v453_v46  ;;  %v487_v6 = vor.u32 1.1754944e-38, %v486_v63  ;;  %vm485_vm3 = vcmp.eq.f32.partialorder %v484_v2, 8.507059e+37  ;;  %v2704_v40 = vld [vmem:[#allocation5 + $0x98] sm:$0xf]  ;;  %v3298_v46 = vld [vmem:[#allocation5 + $0x80] sm:$0xf0] }
  0xcc   :  { %v466_v52 = vpop.f32.mrf.mxu1  ;;  %v2705_v44 = vor.u32 %v3302_v41, %v2704_v40  ;;  %v2660_v2 = vld [vmem:[#allocation5 + $0x48] sm:$0xf]  ;;  %v3282_v40 = vld [vmem:[#allocation5 + $0x4] sm:$0xf]  ;;  %v2626_v41 = vld [vmem:[#allocation5 + $0xc] sm:$0xf0] }
  0xcd   :  { %v2523_v54 = vmul.f32 -1.442695, %v493_v50  ;;  %v514_v4 = vadd.f32 %v513_v0, %v466_v52  ;;  %v2692_v50 = vld [vmem:[#allocation5 + $0x80] sm:$0xf]  ;;  %v2689_v52 = vor.u32 %v3297_v47, %v2686_v49  ;;  %v2629_v47 = vor.u32 %v3282_v40, %v2626_v41  ;;  %v2784_v40 = vld [vmem:[#allocation5 + $0x84] sm:$0xf0] }
  0xce   :  { %v2693_v53 = vor.u32 %v3299_v51, %v2692_v50  ;;  %v2790_v41 = vld [vmem:[#allocation5 + $0x80] sm:$0xf] }
  0xcf   :  { %3435 = vpow2.f32 %v2523_v54  ;;  %v3434_v56 = vpop.eup %3433  ;;  %v3642_v54 = vld [vmem:[#allocation2 + $0x1] ss:$8 sm:$0x7]  ;;  %960 = vmatpush.bf16.msra.mxu2 %v2689_v52 }
  0xd0   :  { %v476_v58 = vmul.f32 %v3434_v56, %v474_v45  ;;  %vm481_vm0 = vweird.f32 %v3434_v56  ;;  %v2684_v45 = vld [vmem:[#allocation5 + $0x78] sm:$0xf] }
  0xd1   :  { %vm482_vm2 = vmor %vm480_vm1, %vm481_vm0  ;;  %v2685_v48 = vor.u32 %v3298_v46, %v2684_v45  ;;  %v2625_v46 = vor.u32 %v3283_v39, %v2624_v35 }
  0xd2   :  { %v455_v57 = vpop.f32.mrf.mxu0  ;;  %v477_v61 = vsub.f32 1.0, %v476_v58  ;;  %v3294_v58 = vld [vmem:[#allocation5 + $0x64] sm:$0xf] }
  0xd3   :  { %947 = vmatpush.bf16.msra.mxu1 %v2685_v48  ;;  %v3295_v57 = vld [vmem:[#allocation5 + $0x68] sm:$0xf0] }
  0xd4   :  { %v468_v59 = vpop.f32.mrf.mxu1  ;;  %v478_v1 = vmul.f32 %v3434_v56, %v477_v61  ;;  %v2680_v61 = vld [vmem:[#allocation5 + $0x68] sm:$0xf] }
  0xd5   :  { %v3436_v60 = vpop.eup %3435 }
  0xd6   :  { %v497_v62 = vadd.f32 1.0, %v3436_v60  ;;  %v479_v3 = vadd.f32 %v3434_v56, %v478_v1  ;;  %v2674_v60 = vld [vmem:[#allocation5 + $0x6c] sm:$0xf0]  ;;  %v748_v1 = vrot.slane %v3642_v54, 1 }
  0xd7   :  { %v2677_v63 = vor.u32 %v3294_v58, %v2674_v60 }
  0xd8   :  { %3437 = vrcp.f32 %v497_v62  ;;  %v483_v7 = vsel %vm482_vm2, %v3434_v56, %v479_v3  ;;  %v509_v15 = vand.u32 2147483648, %v497_v62  ;;  %v507_v17 = vand.u32 2147483647, %v497_v62  ;;  %v2672_v56 = vld [vmem:[#allocation5 + $0x60] sm:$0xf] }
  0xd9   :  { %v488_v8 = vsel %vm485_vm3, %v487_v6, %v483_v7  ;;  %vm503_vm5 = vweird.f32 %v497_v62  ;;  %v2673_v59 = vor.u32 %v3295_v57, %v2672_v56  ;;  %961 = vmatpush.bf16.msra.mxu2 %v2677_v63  ;;  %v3292_v3 = vld [vmem:[#allocation5 + $0x50] sm:$0xf0]  ;;  %v770_v63 = vld [vmem:[%s3791_s4] sm:$0x1] }
  0xda   :  { %v515_v9 = vmul.f32 %v514_v4, %v488_v8  ;;  %v510_v19 = vor.u32 1.1754944e-38, %v509_v15  ;;  %vm508_vm7 = vcmp.eq.f32.partialorder %v507_v17, 8.507059e+37  ;;  %v3291_v4 = vld [vmem:[#allocation5 + $0x4c] sm:$0xf]  ;;  %v2661_v8 = vor.u32 %v3292_v3, %v2660_v2 }
  0xdb   :  { %948 = vmatpush.bf16.msra.mxu1 %v2673_v59 }
  0xdc   :  { %v518_v13 = vadd.f32 %v516_v11, %v515_v9  ;;  %v2662_v9 = vld [vmem:[#allocation5 + $0x54] sm:$0xf0]  ;;  %v3293_v11 = vld [vmem:[#allocation5 + $0x58] sm:$0xf0] }
  0xde   :  { %v3438_v10 = vpop.eup %3437  ;;  %3439 = vtanh.f32 %v518_v13 }
  0xdf   :  { %v499_v12 = vmul.f32 %v3438_v10, %v497_v62  ;;  %vm504_vm4 = vweird.f32 %v3438_v10  ;;  %v3296_v62 = vld [vmem:[#allocation5 + $0x70] sm:$0xf0]  ;;  %949 = vmatpush.bf16.msra.mxu1 %v2661_v8 }
  0xe0   :  { %vm505_vm6 = vmor %vm503_vm5, %vm504_vm4  ;;  %v2681_v0 = vor.u32 %v3296_v62, %v2680_v61 }
  0xe1   :  { %v500_v14 = vsub.f32 1.0, %v499_v12 }
  0xe3   :  { %v501_v16 = vmul.f32 %v3438_v10, %v500_v14  ;;  %v2665_v14 = vor.u32 %v3291_v4, %v2662_v9  ;;  %v773_v9 = vrot.slane %v3642_v54, 2 }
  0xe4   :  { %v3440_v23 = vpop.eup %3439 }
  0xe5   :  { %v502_v18 = vadd.f32 %v3438_v10, %v501_v16  ;;  %962 = vmatpush.bf16.msra.mxu2 %v2665_v14 }
  0xe7   :  { %v506_v20 = vsel %vm505_vm6, %v3438_v10, %v502_v18  ;;  %v2668_v10 = vld [vmem:[#allocation5 + $0x50] sm:$0xf] }
  0xe8   :  { %v511_v21 = vsel %vm508_vm7, %v510_v19, %v506_v20  ;;  %v2669_v15 = vor.u32 %v3293_v11, %v2668_v10  ;;  %v2648_v19 = vld [vmem:[#allocation5 + $0x30] sm:$0xf]  ;;  %v3289_v20 = vld [vmem:[#allocation5 + $0x38] sm:$0xf0] }
  0xe9   :  { %v520_v22 = vsub.f32 1.0, %v511_v21  ;;  %v522_v5 = vmul.f32 %v511_v21, %v3615_v42  ;;  %v3305_v42 = vld [vmem:[#allocation5 + $0xb8] sm:$0xf0]  ;;  %v3288_v21 = vld [vmem:[#allocation5 + $0x34] sm:$0xf] }
  0xea   :  { %v2717_v34 = vor.u32 %v3305_v42, %v2716_v32  ;;  %v2637_v32 = vor.u32 %v3286_v29, %v2636_v27  ;;  %v2641_v42 = vor.u32 %v3285_v30, %v2638_v31  ;;  %v3325_v29 = vld [vmem:[#allocation5 + $0x98] sm:$0xf0]  ;;  %v3324_v30 = vld [vmem:[#allocation5 + $0x94] sm:$0xf] }
  0xeb   :  { %v521_v24 = vmul.f32 %v3440_v23, %v520_v22  ;;  %v2650_v22 = vld [vmem:[#allocation5 + $0x3c] sm:$0xf0]  ;;  %v2649_v23 = vor.u32 %v3289_v20, %v2648_v19  ;;  %v2806_v20 = vld [vmem:[#allocation5 + $0xa8] sm:$0xf] }
  0xec   :  { %971 = vmatpush.bf16.msra.mxu3 %v2717_v34  ;;  %v3287_v34 = vld [vmem:[#allocation5 + $0x28] sm:$0xf0] }
  0xed   :  { %v3634_v25 = vadd.f32 %v522_v5, %v521_v24  ;;  %v2653_v24 = vor.u32 %v3288_v21, %v2650_v22  ;;  %v2656_v5 = vld [vmem:[#allocation5 + $0x38] sm:$0xf]  ;;  %950 = vmatpush.bf16.msra.mxu1 %v2649_v23  ;;  %v2645_v38 = vor.u32 %v3287_v34, %v2644_v33  ;;  %v3328_v21 = vld [vmem:[#allocation5 + $0xb0] sm:$0xf0]  ;;  %v3327_v22 = vld [vmem:[#allocation5 + $0xac] sm:$0xf] }
  0xee   :  { %v2807_v23 = vor.u32 %v3328_v21, %v2806_v20  ;;  %v3326_v33 = vld [vmem:[#allocation5 + $0xa0] sm:$0xf0]  ;;  %v3309_v21 = vld [vmem:[#allocation5 + $0x1c] sm:$0xf] }
  0xef   :  { %524 = vst [vmem:[%s3793_s6] sm:$0x1] %v3634_v25  ;;  %v527_v26 = vpack.c.bf16 %v3634_v25, %v3634_v25  ;;  %963 = vmatpush.bf16.msra.mxu2 %v2653_v24  ;;  %v2808_v24 = vld [vmem:[#allocation5 + $0xb4] sm:$0xf0]  ;;  %v3310_v20 = vld [vmem:[#allocation5 + $0x20] sm:$0xf0] }
  0xf0   :  { %972 = vmatpush.bf16.msra.mxu3 %v2705_v44  ;;  %v3284_v44 = vld [vmem:[#allocation5 + $0x10] sm:$0xf0]  ;;  %1202 = vmatpush.bf16.msrb.mxu0 %v2807_v23 }
  0xf1   :  { %696 = vmatmul.bf16.vlgmr.msrb.gmra.mxu2 %v527_v26  ;;  %709 = vmatmul.bf16.vlgmr.msrb.gmra.mxu3 %v527_v26  ;;  %v2633_v50 = vor.u32 %v3284_v44, %v2632_v43  ;;  %v3323_v43 = vld [vmem:[#allocation5 + $0x88] sm:$0xf0] }
  0xf2   :  { %722 = vmatmul.bf16.vlgmr.msra.gmra.mxu0 %v527_v26  ;;  %v3290_v26 = vld [vmem:[#allocation5 + $0x40] sm:$0xf0]  ;;  %951 = vmatpush.bf16.msra.mxu1 %v2637_v32  ;;  %v2796_v32 = vld [vmem:[#allocation5 + $0x9c] sm:$0xf0] }
  0xf3   :  { %v2657_v28 = vor.u32 %v3290_v26, %v2656_v5  ;;  %964 = vmatpush.bf16.msra.mxu2 %v2641_v42  ;;  %v2814_v5 = vld [vmem:[#allocation5 + $0xb0] sm:$0xf]  ;;  %v2811_v26 = vor.u32 %v3327_v22, %v2808_v24  ;;  %v2802_v42 = vld [vmem:[#allocation5 + $0x98] sm:$0xf]  ;;  %v2799_v34 = vor.u32 %v3324_v30, %v2796_v32  ;;  %v2736_v24 = vld [vmem:[#allocation5 + $0x24] sm:$0xf0] }
  0xf4   :  { %973 = vmatpush.bf16.msra.mxu3 %v2693_v53  ;;  %v2803_v35 = vor.u32 %v3326_v33, %v2802_v42  ;;  %v3307_v30 = vld [vmem:[#allocation5 + $0x8] sm:$0xf0]  ;;  %v2724_v33 = vld [vmem:[#allocation5 + $0xc] sm:$0xf0] }
  0xf6   :  { %952 = vmatpush.bf16.msra.mxu1 %v2625_v46  ;;  %v2770_v46 = vld [vmem:[#allocation5 + $0x60] sm:$0xf] }
  0xf7   :  { %965 = vmatpush.bf16.msra.mxu2 %v2629_v47  ;;  %v3319_v47 = vld [vmem:[#allocation5 + $0x68] sm:$0xf0] }
  0xf8   :  { %974 = vmatpush.bf16.msra.mxu3 %v2681_v0 }
  0xfa   :  { %1215 = vmatpush.bf16.msrb.mxu1 %v2811_v26 }
  0xfc   :  { %975 = vmatpush.bf16.msra.mxu3 %v2669_v15 }
  0xfe   :  { %1216 = vmatpush.bf16.msrb.mxu1 %v2799_v34  ;;  %v2730_v34 = vld [vmem:[#allocation5 + $0x8] sm:$0xf] }
 0x100   :  { %976 = vmatpush.bf16.msra.mxu3 %v2657_v28  ;;  %v2794_v28 = vld [vmem:[#allocation5 + $0x90] sm:$0xf] }
 0x101   :  { %v2795_v31 = vor.u32 %v3325_v29, %v2794_v28  ;;  %v2722_v29 = vld [vmem:[#allocation5] sm:$0xf] }
 0x102   :  { %v2723_v42 = vor.u32 %v3307_v30, %v2722_v29 }
 0x103   :  { %1203 = vmatpush.bf16.msrb.mxu0 %v2795_v31  ;;  %v3306_v31 = vld [vmem:[#allocation5 + $0x4] sm:$0xf] }
 0x104   :  { %977 = vmatpush.bf16.msra.mxu3 %v2645_v38  ;;  %v3321_v38 = vld [vmem:[#allocation5 + $0x7c] sm:$0xf] }
 0x105   :  { %v2787_v44 = vor.u32 %v3321_v38, %v2784_v40 }
 0x107   :  { %1217 = vmatpush.bf16.msrb.mxu1 %v2787_v44 }
 0x108   :  { %978 = vmatpush.bf16.msra.mxu3 %v2633_v50  ;;  %v2772_v50 = vld [vmem:[#allocation5 + $0x6c] sm:$0xf0] }
 0x16f   :  { %v3644_v55 = vpop.f32.mrf.mxu0 }
 0x170   :  { %v771_v3 = vadd.f32 %v770_v63, %v3644_v55  ;;  %v2760_v63 = vld [vmem:[#allocation5 + $0x54] sm:$0xf0] }
 0x174   :  { %v697_v6 = vpop.f32.mrf.mxu2  ;;  %v710_v7 = vpop.f32.mrf.mxu3 }
 0x175   :  { %v727_v12 = vadd.f32 %v697_v6, %v3642_v54  ;;  %v750_v13 = vadd.f32 %v748_v1, %v710_v7 }
 0x177   :  { %v2620_v16 = vmul.f32 -1.442695, %v727_v12  ;;  %v2621_v17 = vmul.f32 -1.442695, %v750_v13  ;;  %v725_v18 = vpop.f32.mrf.mxu0 }
 0x179   :  { %3441 = vpow2.f32 %v2620_v16 }
 0x17a   :  { %3443 = vpow2.f32 %v2621_v17 }
 0x17c   :  { %v699_v36 = vpop.f32.mrf.mxu2  ;;  %v712_v37 = vpop.f32.mrf.mxu3 }
 0x17d   :  { %v2782_v36 = vld [vmem:[#allocation5 + $0x78] sm:$0xf]  ;;  %v3322_v37 = vld [vmem:[#allocation5 + $0x80] sm:$0xf0] }
 0x17e   :  { %v2783_v39 = vor.u32 %v3322_v37, %v2782_v36  ;;  %v2727_v37 = vor.u32 %v3306_v31, %v2724_v33  ;;  %v2880_v31 = vld [vmem:[#allocation5 + $0x78] sm:$0xf] }
 0x17f   :  { %v3442_v45 = vpop.eup %3441 }
 0x180   :  { %v3444_v48 = vpop.eup %3443  ;;  %v731_v49 = vadd.f32 1.0, %v3442_v45  ;;  %v2791_v45 = vor.u32 %v3323_v43, %v2790_v41  ;;  %1204 = vmatpush.bf16.msrb.mxu0 %v2783_v39 }
 0x181   :  { %v754_v51 = vadd.f32 1.0, %v3444_v48  ;;  %v3318_v48 = vld [vmem:[#allocation5 + $0x64] sm:$0xf] }
 0x182   :  { %3445 = vrcp.f32 %v731_v49  ;;  %v743_v59 = vand.u32 2147483648, %v731_v49  ;;  %v741_v62 = vand.u32 2147483647, %v731_v49  ;;  %vm737_vm9 = vweird.f32 %v731_v49 }
 0x183   :  { %3447 = vrcp.f32 %v754_v51  ;;  %v766_v10 = vand.u32 2147483648, %v754_v51  ;;  %vm760_vm13 = vweird.f32 %v754_v51  ;;  %v764_v11 = vand.u32 2147483647, %v754_v51 }
 0x184   :  { %v744_v2 = vor.u32 1.1754944e-38, %v743_v59  ;;  %vm742_vm11 = vcmp.eq.f32.partialorder %v741_v62, 8.507059e+37  ;;  %v3316_v59 = vld [vmem:[#allocation5 + $0x50] sm:$0xf0] }
 0x185   :  { %v767_v14 = vor.u32 1.1754944e-38, %v766_v10  ;;  %vm765_vm15 = vcmp.eq.f32.partialorder %v764_v11, 8.507059e+37  ;;  %v3312_v10 = vld [vmem:[#allocation5 + $0x34] sm:$0xf]  ;;  %v2748_v11 = vld [vmem:[#allocation5 + $0x3c] sm:$0xf0] }
 0x188   :  { %v3446_v52 = vpop.eup %3445 }
 0x189   :  { %v3448_v53 = vpop.eup %3447  ;;  %v733_v56 = vmul.f32 %v3446_v52, %v731_v49  ;;  %vm738_vm8 = vweird.f32 %v3446_v52  ;;  %v2771_v49 = vor.u32 %v3319_v47, %v2770_v46 }
 0x18a   :  { %v756_v57 = vmul.f32 %v3448_v53, %v754_v51  ;;  %vm739_vm10 = vmor %vm737_vm9, %vm738_vm8  ;;  %vm761_vm12 = vweird.f32 %v3448_v53  ;;  %v2778_v51 = vld [vmem:[#allocation5 + $0x68] sm:$0xf] }
 0x18b   :  { %v734_v58 = vsub.f32 1.0, %v733_v56  ;;  %vm762_vm14 = vmor %vm760_vm13, %vm761_vm12  ;;  %1205 = vmatpush.bf16.msrb.mxu0 %v2771_v49 }
 0x18c   :  { %v757_v60 = vsub.f32 1.0, %v756_v57  ;;  %v3662_v57 = vld [vmem:[#allocation2 + $0x2] ss:$8 sm:$0x7] }
 0x18d   :  { %v735_v61 = vmul.f32 %v3446_v52, %v734_v58  ;;  %v2758_v58 = vld [vmem:[#allocation5 + $0x48] sm:$0xf] }
 0x18e   :  { %v758_v0 = vmul.f32 %v3448_v53, %v757_v60  ;;  %v3315_v60 = vld [vmem:[#allocation5 + $0x4c] sm:$0xf]  ;;  %v2759_v62 = vor.u32 %v3316_v59, %v2758_v58 }
 0x18f   :  { %v736_v1 = vadd.f32 %v3446_v52, %v735_v61 }
 0x190   :  { %v759_v7 = vadd.f32 %v3448_v53, %v758_v0  ;;  %v2766_v0 = vld [vmem:[#allocation5 + $0x50] sm:$0xf]  ;;  %1206 = vmatpush.bf16.msrb.mxu0 %v2759_v62 }
 0x191   :  { %v740_v4 = vsel %vm739_vm10, %v3446_v52, %v736_v1  ;;  %v3320_v52 = vld [vmem:[#allocation5 + $0x70] sm:$0xf0]  ;;  %v3317_v1 = vld [vmem:[#allocation5 + $0x58] sm:$0xf0] }
 0x192   :  { %v745_v6 = vsel %vm742_vm11, %v744_v2, %v740_v4  ;;  %v763_v13 = vsel %vm762_vm14, %v3448_v53, %v759_v7  ;;  %v2775_v53 = vor.u32 %v3318_v48, %v2772_v50  ;;  %v2779_v56 = vor.u32 %v3320_v52, %v2778_v51  ;;  %v2746_v7 = vld [vmem:[#allocation5 + $0x30] sm:$0xf]  ;;  %v1027_v51 = vld [vmem:[%s3791_s4] sm:$0x1] }
 0x193   :  { %v772_v8 = vmul.f32 %v771_v3, %v745_v6  ;;  %v768_v15 = vsel %vm765_vm15, %v767_v14, %v763_v13  ;;  %v2763_v3 = vor.u32 %v3315_v60, %v2760_v63  ;;  %v2767_v4 = vor.u32 %v3317_v1, %v2766_v0 }
 0x194   :  { %v777_v16 = vsub.f32 1.0, %v768_v15  ;;  %v779_v18 = vmul.f32 %v768_v15, %v3634_v25  ;;  %v3329_v25 = vld [vmem:[#allocation5 + $0xb8] sm:$0xf0]  ;;  %1218 = vmatpush.bf16.msrb.mxu1 %v2775_v53  ;;  %v1005_v13 = vrot.slane %v3662_v57, 1  ;;  %v2751_v14 = vor.u32 %v3312_v10, %v2748_v11  ;;  %v3314_v15 = vld [vmem:[#allocation5 + $0x40] sm:$0xf0] }
 0x195   :  { %v775_v12 = vadd.f32 %v773_v9, %v772_v8  ;;  %v2815_v27 = vor.u32 %v3329_v25, %v2814_v5  ;;  %v3313_v8 = vld [vmem:[#allocation5 + $0x38] sm:$0xf0]  ;;  %v2742_v5 = vld [vmem:[#allocation5 + $0x20] sm:$0xf]  ;;  %v3311_v25 = vld [vmem:[#allocation5 + $0x28] sm:$0xf0] }
 0x196   :  { %v2747_v9 = vor.u32 %v3313_v8, %v2746_v7  ;;  %v2743_v28 = vor.u32 %v3311_v25, %v2742_v5  ;;  %v2894_v25 = vld [vmem:[#allocation5 + $0x9c] sm:$0xf0] }
 0x197   :  { %3449 = vtanh.f32 %v775_v12  ;;  %1228 = vmatpush.bf16.msrb.mxu2 %v2815_v27  ;;  %v2754_v12 = vld [vmem:[#allocation5 + $0x38] sm:$0xf]  ;;  %v2739_v27 = vor.u32 %v3309_v21, %v2736_v24  ;;  %v3348_v24 = vld [vmem:[#allocation5 + $0x94] sm:$0xf] }
 0x198   :  { %1219 = vmatpush.bf16.msrb.mxu1 %v2763_v3  ;;  %1207 = vmatpush.bf16.msrb.mxu0 %v2747_v9  ;;  %v3679_v21 = vld [vmem:[#allocation2 + $0x3] ss:$8 sm:$0x7] }
 0x199   :  { %v1262_v30 = vrot.slane %v3679_v21, 1 }
 0x19b   :  { %1229 = vmatpush.bf16.msrb.mxu2 %v2803_v35  ;;  %v3308_v35 = vld [vmem:[#allocation5 + $0x10] sm:$0xf0] }
 0x19c   :  { %1220 = vmatpush.bf16.msrb.mxu1 %v2751_v14  ;;  %v2731_v38 = vor.u32 %v3308_v35, %v2730_v34  ;;  %v2904_v14 = vld [vmem:[#allocation5 + $0xa8] sm:$0xf]  ;;  %v2888_v35 = vld [vmem:[#allocation5 + $0x80] sm:$0xf] }
 0x19d   :  { %v3450_v55 = vpop.eup %3449  ;;  %v2882_v34 = vld [vmem:[#allocation5 + $0x84] sm:$0xf0] }
 0x19e   :  { %v778_v17 = vmul.f32 %v3450_v55, %v777_v16  ;;  %v2755_v55 = vor.u32 %v3314_v15, %v2754_v12  ;;  %v3352_v15 = vld [vmem:[#allocation5 + $0xb0] sm:$0xf0] }
 0x19f   :  { %1230 = vmatpush.bf16.msrb.mxu2 %v2791_v45 }
 0x1a0   :  { %v3654_v19 = vadd.f32 %v779_v18, %v778_v17  ;;  %1221 = vmatpush.bf16.msrb.mxu1 %v2739_v27  ;;  %v3350_v27 = vld [vmem:[#allocation5 + $0xa0] sm:$0xf0] }
 0x1a2   :  { %781 = vst [vmem:[%s3793_s6 + $0x1] sm:$0x1] %v3654_v19  ;;  %v784_v54 = vpack.c.bf16 %v3654_v19, %v3654_v19 }
 0x1a3   :  { %1231 = vmatpush.bf16.msrb.mxu2 %v2779_v56 }
 0x1a4   :  { %953 = vmatmul.bf16.vlgmr.msra.gmra.mxu1 %v784_v54  ;;  %966 = vmatmul.bf16.vlgmr.msra.gmra.mxu2 %v784_v54 }
 0x1a5   :  { %979 = vmatmul.bf16.vlgmr.msra.gmra.mxu3 %v784_v54  ;;  %v2734_v54 = vld [vmem:[#allocation5 + $0x18] sm:$0xf]  ;;  %1222 = vmatpush.bf16.msrb.mxu1 %v2727_v37 }
 0x1a6   :  { %v2735_v23 = vor.u32 %v3310_v20, %v2734_v54 }
 0x1a7   :  { %1232 = vmatpush.bf16.msrb.mxu2 %v2767_v4 }
 0x1a8   :  { %1208 = vmatpush.bf16.msrb.mxu0 %v2735_v23  ;;  %v3349_v23 = vld [vmem:[#allocation5 + $0x98] sm:$0xf0] }
 0x1ab   :  { %1233 = vmatpush.bf16.msrb.mxu2 %v2755_v55  ;;  %v2905_v55 = vor.u32 %v3352_v15, %v2904_v14  ;;  %v3338_v14 = vld [vmem:[#allocation5 + $0x40] sm:$0xf0] }
 0x1ac   :  { %1209 = vmatpush.bf16.msrb.mxu0 %v2723_v42  ;;  %v3345_v42 = vld [vmem:[#allocation5 + $0x7c] sm:$0xf] }
 0x1ad   :  { %1459 = vmatpush.bf16.msrb.mxu3 %v2905_v55 }
 0x1af   :  { %1234 = vmatpush.bf16.msrb.mxu2 %v2743_v28  ;;  %v2897_v28 = vor.u32 %v3348_v24, %v2894_v25  ;;  %v2840_v24 = vld [vmem:[#allocation5 + $0x20] sm:$0xf]  ;;  %v3335_v25 = vld [vmem:[#allocation5 + $0x28] sm:$0xf0] }
 0x1b3   :  { %1235 = vmatpush.bf16.msrb.mxu2 %v2731_v38 }
 0x221   :  { %v954_v61 = vpop.f32.mrf.mxu1 }
 0x222   :  { %v984_v2 = vadd.f32 %v954_v61, %v3662_v57  ;;  %v1030_v61 = vrot.slane %v3662_v57, 2 }
 0x224   :  { %v2718_v6 = vmul.f32 -1.442695, %v984_v2 }
 0x226   :  { %3451 = vpow2.f32 %v2718_v6 }
 0x227   :  { %v967_v16 = vpop.f32.mrf.mxu2 }
 0x228   :  { %v1007_v17 = vadd.f32 %v1005_v13, %v967_v16  ;;  %v980_v18 = vpop.f32.mrf.mxu3  ;;  %v3351_v16 = vld [vmem:[#allocation5 + $0xac] sm:$0xf] }
 0x229   :  { %v956_v22 = vpop.f32.mrf.mxu1  ;;  %v1028_v60 = vadd.f32 %v1027_v51, %v980_v18  ;;  %v2912_v18 = vld [vmem:[#allocation5 + $0xb0] sm:$0xf] }
 0x22a   :  { %v2719_v26 = vmul.f32 -1.442695, %v1007_v17  ;;  %v2906_v17 = vld [vmem:[#allocation5 + $0xb4] sm:$0xf0]  ;;  %v2892_v22 = vld [vmem:[#allocation5 + $0x90] sm:$0xf] }
 0x22b   :  { %v2909_v54 = vor.u32 %v3351_v16, %v2906_v17  ;;  %v2893_v5 = vor.u32 %v3349_v23, %v2892_v22  ;;  %v3333_v22 = vld [vmem:[#allocation5 + $0x1c] sm:$0xf]  ;;  %v2834_v23 = vld [vmem:[#allocation5 + $0x24] sm:$0xf0] }
 0x22c   :  { %v3452_v32 = vpop.eup %3451  ;;  %3453 = vpow2.f32 %v2719_v26  ;;  %v2900_v26 = vld [vmem:[#allocation5 + $0x98] sm:$0xf] }
 0x22d   :  { %v988_v36 = vadd.f32 1.0, %v3452_v32  ;;  %1472 = vmatpush.bf16.msra.mxu0 %v2909_v54  ;;  %v2901_v29 = vor.u32 %v3350_v27, %v2900_v26  ;;  %1460 = vmatpush.bf16.msrb.mxu3 %v2893_v5  ;;  %v3346_v32 = vld [vmem:[#allocation5 + $0x80] sm:$0xf0]  ;;  %v2837_v26 = vor.u32 %v3333_v22, %v2834_v23  ;;  %v2841_v27 = vor.u32 %v3335_v25, %v2840_v24  ;;  %v2992_v23 = vld [vmem:[#allocation5 + $0x9c] sm:$0xf0] }
 0x22e   :  { %v2881_v33 = vor.u32 %v3346_v32, %v2880_v31  ;;  %v3330_v31 = vld [vmem:[#allocation5 + $0x4] sm:$0xf]  ;;  %v2822_v32 = vld [vmem:[#allocation5 + $0xc] sm:$0xf0]  ;;  %v2998_v24 = vld [vmem:[#allocation5 + $0x98] sm:$0xf] }
 0x22f   :  { %3455 = vrcp.f32 %v988_v36  ;;  %v969_v39 = vpop.f32.mrf.mxu2  ;;  %v1000_v47 = vand.u32 2147483648, %v988_v36  ;;  %v998_v49 = vand.u32 2147483647, %v988_v36  ;;  %vm994_vm1 = vweird.f32 %v988_v36 }
 0x230   :  { %v982_v40 = vpop.f32.mrf.mxu3  ;;  %v2885_v39 = vor.u32 %v3345_v42, %v2882_v34  ;;  %v2825_v42 = vor.u32 %v3330_v31, %v2822_v32  ;;  %v3332_v34 = vld [vmem:[#allocation5 + $0x10] sm:$0xf0] }
 0x231   :  { %v1001_v56 = vor.u32 1.1754944e-38, %v1000_v47  ;;  %vm999_vm3 = vcmp.eq.f32.partialorder %v998_v49, 8.507059e+37  ;;  %1473 = vmatpush.bf16.msra.mxu0 %v2897_v28  ;;  %1461 = vmatpush.bf16.msrb.mxu3 %v2881_v33  ;;  %v2820_v28 = vld [vmem:[#allocation5] sm:$0xf]  ;;  %v2828_v33 = vld [vmem:[#allocation5 + $0x8] sm:$0xf] }
 0x232   :  { %v3454_v41 = vpop.eup %3453 }
 0x233   :  { %v1011_v43 = vadd.f32 1.0, %v3454_v41 }
 0x235   :  { %v3456_v44 = vpop.eup %3455  ;;  %3457 = vrcp.f32 %v1011_v43  ;;  %v1023_v0 = vand.u32 2147483648, %v1011_v43  ;;  %v1021_v2 = vand.u32 2147483647, %v1011_v43  ;;  %vm1017_vm5 = vweird.f32 %v1011_v43  ;;  %1474 = vmatpush.bf16.msra.mxu0 %v2885_v39 }
 0x236   :  { %v990_v45 = vmul.f32 %v3456_v44, %v988_v36  ;;  %vm995_vm0 = vweird.f32 %v3456_v44  ;;  %v3347_v36 = vld [vmem:[#allocation5 + $0x88] sm:$0xf0] }
 0x237   :  { %vm996_vm2 = vmor %vm994_vm1, %vm995_vm0  ;;  %v1024_v6 = vor.u32 1.1754944e-38, %v1023_v0  ;;  %vm1022_vm7 = vcmp.eq.f32.partialorder %v1021_v2, 8.507059e+37  ;;  %v2889_v40 = vor.u32 %v3347_v36, %v2888_v35  ;;  %v2864_v0 = vld [vmem:[#allocation5 + $0x50] sm:$0xf]  ;;  %v2829_v35 = vor.u32 %v3332_v34, %v2828_v33  ;;  %v2986_v33 = vld [vmem:[#allocation5 + $0x80] sm:$0xf] }
 0x238   :  { %v991_v46 = vsub.f32 1.0, %v990_v45  ;;  %v3343_v45 = vld [vmem:[#allocation5 + $0x68] sm:$0xf0] }
 0x239   :  { %v3371_v34 = vld [vmem:[#allocation5 + $0x88] sm:$0xf0] }
 0x23a   :  { %v992_v48 = vmul.f32 %v3456_v44, %v991_v46  ;;  %v3342_v46 = vld [vmem:[#allocation5 + $0x64] sm:$0xf] }
 0x23b   :  { %v3458_v50 = vpop.eup %3457 }
 0x23c   :  { %v1013_v52 = vmul.f32 %v3458_v50, %v1011_v43  ;;  %v993_v53 = vadd.f32 %v3456_v44, %v992_v48  ;;  %vm1018_vm4 = vweird.f32 %v3458_v50 }
 0x23d   :  { %vm1019_vm6 = vmor %vm1017_vm5, %vm1018_vm4 }
 0x23e   :  { %v1014_v58 = vsub.f32 1.0, %v1013_v52  ;;  %v997_v59 = vsel %vm996_vm2, %v3456_v44, %v993_v53  ;;  %v2868_v44 = vld [vmem:[#allocation5 + $0x60] sm:$0xf]  ;;  %v2876_v52 = vld [vmem:[#allocation5 + $0x68] sm:$0xf] }
 0x23f   :  { %v1002_v62 = vsel %vm999_vm3, %v1001_v56, %v997_v59  ;;  %v2869_v49 = vor.u32 %v3343_v45, %v2868_v44  ;;  %v3344_v53 = vld [vmem:[#allocation5 + $0x70] sm:$0xf0] }
 0x240   :  { %v1015_v63 = vmul.f32 %v3458_v50, %v1014_v58  ;;  %v1029_v1 = vmul.f32 %v1028_v60, %v1002_v62  ;;  %v2877_v56 = vor.u32 %v3344_v53, %v2876_v52  ;;  %v2856_v58 = vld [vmem:[#allocation5 + $0x48] sm:$0xf]  ;;  %v3340_v59 = vld [vmem:[#allocation5 + $0x50] sm:$0xf0]  ;;  %v3339_v60 = vld [vmem:[#allocation5 + $0x4c] sm:$0xf] }
 0x241   :  { %1462 = vmatpush.bf16.msrb.mxu3 %v2869_v49  ;;  %v2857_v62 = vor.u32 %v3340_v59, %v2856_v58 }
 0x242   :  { %v1016_v3 = vadd.f32 %v3458_v50, %v1015_v63  ;;  %v1032_v4 = vadd.f32 %v1030_v61, %v1029_v1  ;;  %v2858_v63 = vld [vmem:[#allocation5 + $0x54] sm:$0xf0]  ;;  %v3341_v1 = vld [vmem:[#allocation5 + $0x58] sm:$0xf0] }
 0x244   :  { %v1020_v7 = vsel %vm1019_vm6, %v3458_v50, %v1016_v3  ;;  %3459 = vtanh.f32 %v1032_v4  ;;  %v2870_v50 = vld [vmem:[#allocation5 + $0x6c] sm:$0xf0]  ;;  %v2861_v4 = vor.u32 %v3339_v60, %v2858_v63 }
 0x245   :  { %v1025_v8 = vsel %vm1022_vm7, %v1024_v6, %v1020_v7  ;;  %v2873_v51 = vor.u32 %v3342_v46, %v2870_v50  ;;  %v2865_v6 = vor.u32 %v3341_v1, %v2864_v0  ;;  %1463 = vmatpush.bf16.msrb.mxu3 %v2857_v62  ;;  %v2844_v7 = vld [vmem:[#allocation5 + $0x30] sm:$0xf] }
 0x246   :  { %v1034_v9 = vsub.f32 1.0, %v1025_v8  ;;  %v1036_v57 = vmul.f32 %v1025_v8, %v3654_v19  ;;  %v3353_v19 = vld [vmem:[#allocation5 + $0xb8] sm:$0xf0] }
 0x247   :  { %v2913_v20 = vor.u32 %v3353_v19, %v2912_v18  ;;  %1475 = vmatpush.bf16.msra.mxu0 %v2873_v51  ;;  %v3337_v8 = vld [vmem:[#allocation5 + $0x38] sm:$0xf0]  ;;  %v2832_v18 = vld [vmem:[#allocation5 + $0x18] sm:$0xf]  ;;  %v3334_v19 = vld [vmem:[#allocation5 + $0x20] sm:$0xf0] }
 0x249   :  { %1485 = vmatpush.bf16.msra.mxu1 %v2913_v20  ;;  %v2833_v20 = vor.u32 %v3334_v19, %v2832_v18  ;;  %v2990_v19 = vld [vmem:[#allocation5 + $0x90] sm:$0xf] }
 0x24a   :  { %v3460_v10 = vpop.eup %3459 }
 0x24b   :  { %v1035_v11 = vmul.f32 %v3460_v10, %v1034_v9  ;;  %1476 = vmatpush.bf16.msra.mxu0 %v2861_v4  ;;  %v3336_v9 = vld [vmem:[#allocation5 + $0x34] sm:$0xf] }
 0x24d   :  { %v3671_v12 = vadd.f32 %v1036_v57, %v1035_v11  ;;  %1486 = vmatpush.bf16.msra.mxu1 %v2901_v29  ;;  %v2845_v11 = vor.u32 %v3337_v8, %v2844_v7  ;;  %v2846_v57 = vld [vmem:[#allocation5 + $0x3c] sm:$0xf0]  ;;  %v3331_v29 = vld [vmem:[#allocation5 + $0x8] sm:$0xf0]  ;;  %v3002_v8 = vld [vmem:[#allocation5 + $0xa8] sm:$0xf] }
 0x24e   :  { %v2849_v55 = vor.u32 %v3336_v9, %v2846_v57  ;;  %v3699_v7 = vld [vmem:[#allocation2 + $0x4] ss:$8 sm:$0x7]  ;;  %v3010_v57 = vld [vmem:[#allocation5 + $0xb0] sm:$0xf] }
 0x24f   :  { %1038 = vst [vmem:[%s3793_s6 + $0x2] sm:$0x1] %v3671_v12  ;;  %v1041_v13 = vpack.c.bf16 %v3671_v12, %v3671_v12  ;;  %1464 = vmatpush.bf16.msrb.mxu3 %v2845_v11  ;;  %v3376_v9 = vld [vmem:[#allocation5 + $0xb0] sm:$0xf0] }
 0x250   :  { %1477 = vmatpush.bf16.msra.mxu0 %v2849_v55  ;;  %v3003_v11 = vor.u32 %v3376_v9, %v3002_v8  ;;  %v2950_v8 = vld [vmem:[#allocation5 + $0x38] sm:$0xf]  ;;  %v3362_v9 = vld [vmem:[#allocation5 + $0x40] sm:$0xf0] }
 0x251   :  { %1210 = vmatmul.bf16.vlgmr.msrb.gmra.mxu0 %v1041_v13  ;;  %1223 = vmatmul.bf16.vlgmr.msrb.gmra.mxu1 %v1041_v13 }
 0x252   :  { %1236 = vmatmul.bf16.vlgmr.msrb.gmra.mxu2 %v1041_v13  ;;  %1487 = vmatpush.bf16.msra.mxu1 %v2889_v40  ;;  %v2852_v13 = vld [vmem:[#allocation5 + $0x38] sm:$0xf] }
 0x253   :  { %v2853_v17 = vor.u32 %v3338_v14, %v2852_v13  ;;  %1465 = vmatpush.bf16.msrb.mxu3 %v2833_v20  ;;  %v3377_v13 = vld [vmem:[#allocation5 + $0xb8] sm:$0xf0]  ;;  %v1519_v14 = vrot.slane %v3699_v7, 1  ;;  %1716 = vmatpush.bf16.msra.mxu2 %v3003_v11  ;;  %v3372_v20 = vld [vmem:[#allocation5 + $0x94] sm:$0xf] }
 0x254   :  { %1478 = vmatpush.bf16.msra.mxu0 %v2837_v26  ;;  %v2995_v26 = vor.u32 %v3372_v20, %v2992_v23  ;;  %v2930_v11 = vld [vmem:[#allocation5 + $0x18] sm:$0xf] }
 0x256   :  { %1488 = vmatpush.bf16.msra.mxu1 %v2877_v56  ;;  %v1287_v56 = vrot.slane %v3679_v21, 2 }
 0x258   :  { %1479 = vmatpush.bf16.msra.mxu0 %v2825_v42  ;;  %v2980_v42 = vld [vmem:[#allocation5 + $0x84] sm:$0xf0] }
 0x25a   :  { %1489 = vmatpush.bf16.msra.mxu1 %v2865_v6 }
 0x25e   :  { %1490 = vmatpush.bf16.msra.mxu1 %v2853_v17 }
 0x262   :  { %1491 = vmatpush.bf16.msra.mxu1 %v2841_v27 }
 0x266   :  { %1492 = vmatpush.bf16.msra.mxu1 %v2829_v35 }
 0x2ce   :  { %v1211_v37 = vpop.f32.mrf.mxu0  ;;  %v1224_v38 = vpop.f32.mrf.mxu1 }
 0x2cf   :  { %v1241_v41 = vadd.f32 %v1211_v37, %v3679_v21  ;;  %v1264_v43 = vadd.f32 %v1262_v30, %v1224_v38  ;;  %v2821_v30 = vor.u32 %v3331_v29, %v2820_v28  ;;  %v2978_v28 = vld [vmem:[#allocation5 + $0x78] sm:$0xf]  ;;  %v3370_v29 = vld [vmem:[#allocation5 + $0x80] sm:$0xf0] }
 0x2d0   :  { %v2979_v32 = vor.u32 %v3370_v29, %v2978_v28  ;;  %v3356_v28 = vld [vmem:[#allocation5 + $0x10] sm:$0xf0] }
 0x2d1   :  { %v2816_v47 = vmul.f32 -1.442695, %v1241_v41  ;;  %v2817_v48 = vmul.f32 -1.442695, %v1264_v43  ;;  %1466 = vmatpush.bf16.msrb.mxu3 %v2821_v30  ;;  %v3369_v30 = vld [vmem:[#allocation5 + $0x7c] sm:$0xf] }
 0x2d3   :  { %3461 = vpow2.f32 %v2816_v47  ;;  %v1284_v47 = vld [vmem:[%s3791_s4] sm:$0x1] }
 0x2d4   :  { %3463 = vpow2.f32 %v2817_v48 }
 0x2d5   :  { %v3683_v61 = vpop.f32.mrf.mxu2 }
 0x2d6   :  { %v1213_v2 = vpop.f32.mrf.mxu0  ;;  %v1226_v3 = vpop.f32.mrf.mxu1  ;;  %v1285_v51 = vadd.f32 %v1284_v47, %v3683_v61 }
 0x2d9   :  { %v3462_v10 = vpop.eup %3461 }
 0x2da   :  { %v3464_v15 = vpop.eup %3463  ;;  %v1245_v16 = vadd.f32 1.0, %v3462_v10  ;;  %v3375_v10 = vld [vmem:[#allocation5 + $0xac] sm:$0xf] }
 0x2db   :  { %v1268_v54 = vadd.f32 1.0, %v3464_v15 }
 0x2dc   :  { %3465 = vrcp.f32 %v1245_v16  ;;  %v1257_v43 = vand.u32 2147483648, %v1245_v16  ;;  %v1255_v45 = vand.u32 2147483647, %v1245_v16  ;;  %vm1251_vm9 = vweird.f32 %v1245_v16 }
 0x2dd   :  { %3467 = vrcp.f32 %v1268_v54  ;;  %v1239_v5 = vpop.f32.mrf.mxu2  ;;  %v1280_v58 = vand.u32 2147483648, %v1268_v54  ;;  %vm1274_vm13 = vweird.f32 %v1268_v54  ;;  %v1278_v60 = vand.u32 2147483647, %v1268_v54 }
 0x2de   :  { %v1258_v49 = vor.u32 1.1754944e-38, %v1257_v43  ;;  %vm1256_vm11 = vcmp.eq.f32.partialorder %v1255_v45, 8.507059e+37  ;;  %v3374_v5 = vld [vmem:[#allocation5 + $0xa0] sm:$0xf0]  ;;  %v2974_v45 = vld [vmem:[#allocation5 + $0x68] sm:$0xf] }
 0x2df   :  { %v1281_v0 = vor.u32 1.1754944e-38, %v1280_v58  ;;  %vm1279_vm15 = vcmp.eq.f32.partialorder %v1278_v60, 8.507059e+37  ;;  %v2999_v27 = vor.u32 %v3374_v5, %v2998_v24  ;;  %v2962_v58 = vld [vmem:[#allocation5 + $0x50] sm:$0xf]  ;;  %v3365_v60 = vld [vmem:[#allocation5 + $0x58] sm:$0xf0] }
 0x2e0   :  { %v2918_v24 = vld [vmem:[#allocation5] sm:$0xf]  ;;  %v3355_v5 = vld [vmem:[#allocation5 + $0x8] sm:$0xf0] }
 0x2e2   :  { %v3466_v36 = vpop.eup %3465 }
 0x2e3   :  { %v3468_v37 = vpop.eup %3467  ;;  %v1247_v38 = vmul.f32 %v3466_v36, %v1245_v16  ;;  %vm1252_vm8 = vweird.f32 %v3466_v36  ;;  %v3011_v16 = vor.u32 %v3377_v13, %v3010_v57  ;;  %v2951_v13 = vor.u32 %v3362_v9, %v2950_v8 }
 0x2e4   :  { %v1270_v39 = vmul.f32 %v3468_v37, %v1268_v54  ;;  %vm1253_vm10 = vmor %vm1251_vm9, %vm1252_vm8  ;;  %vm1275_vm12 = vweird.f32 %v3468_v37  ;;  %v3373_v54 = vld [vmem:[#allocation5 + $0x98] sm:$0xf0] }
 0x2e5   :  { %v1248_v40 = vsub.f32 1.0, %v1247_v38  ;;  %vm1276_vm14 = vmor %vm1274_vm13, %vm1275_vm12  ;;  %1742 = vmatpush.bf16.msrb.mxu0 %v3011_v16  ;;  %v2991_v22 = vor.u32 %v3373_v54, %v2990_v19  ;;  %v2966_v38 = vld [vmem:[#allocation5 + $0x60] sm:$0xf]  ;;  %v2932_v16 = vld [vmem:[#allocation5 + $0x24] sm:$0xf0] }
 0x2e6   :  { %v1271_v41 = vsub.f32 1.0, %v1270_v39  ;;  %v3367_v39 = vld [vmem:[#allocation5 + $0x68] sm:$0xf0] }
 0x2e7   :  { %v1249_v44 = vmul.f32 %v3466_v36, %v1248_v40  ;;  %1717 = vmatpush.bf16.msra.mxu2 %v2991_v22  ;;  %v3366_v40 = vld [vmem:[#allocation5 + $0x64] sm:$0xf]  ;;  %v2967_v43 = vor.u32 %v3367_v39, %v2966_v38  ;;  %v3359_v19 = vld [vmem:[#allocation5 + $0x28] sm:$0xf0] }
 0x2e8   :  { %v1272_v46 = vmul.f32 %v3468_v37, %v1271_v41 }
 0x2e9   :  { %v1250_v48 = vadd.f32 %v3466_v36, %v1249_v44  ;;  %1743 = vmatpush.bf16.msrb.mxu0 %v2999_v27  ;;  %v2968_v44 = vld [vmem:[#allocation5 + $0x6c] sm:$0xf0]  ;;  %v2926_v27 = vld [vmem:[#allocation5 + $0x8] sm:$0xf] }
 0x2ea   :  { %v1273_v52 = vadd.f32 %v3468_v37, %v1272_v46  ;;  %v3368_v46 = vld [vmem:[#allocation5 + $0x70] sm:$0xf0] }
 0x2eb   :  { %v1254_v50 = vsel %vm1253_vm10, %v3466_v36, %v1250_v48  ;;  %v2983_v36 = vor.u32 %v3369_v30, %v2980_v42  ;;  %1718 = vmatpush.bf16.msra.mxu2 %v2979_v32  ;;  %v2919_v30 = vor.u32 %v3355_v5, %v2918_v24  ;;  %v2927_v32 = vor.u32 %v3356_v28, %v2926_v27  ;;  %v3076_v24 = vld [vmem:[#allocation5 + $0x78] sm:$0xf]  ;;  %v3394_v5 = vld [vmem:[#allocation5 + $0x80] sm:$0xf0]  ;;  %v3078_v27 = vld [vmem:[#allocation5 + $0x84] sm:$0xf0] }
 0x2ec   :  { %v1259_v53 = vsel %vm1256_vm11, %v1258_v49, %v1254_v50  ;;  %v1277_v63 = vsel %vm1276_vm14, %v3468_v37, %v1273_v52  ;;  %v2987_v37 = vor.u32 %v3371_v34, %v2986_v33  ;;  %v2971_v49 = vor.u32 %v3366_v40, %v2968_v44  ;;  %v3364_v52 = vld [vmem:[#allocation5 + $0x50] sm:$0xf0]  ;;  %v1541_v40 = vld [vmem:[%s3791_s4] sm:$0x1]  ;;  %v3084_v28 = vld [vmem:[#allocation5 + $0x80] sm:$0xf] }
 0x2ed   :  { %v1286_v59 = vmul.f32 %v1285_v51, %v1259_v53  ;;  %v1282_v1 = vsel %vm1279_vm15, %v1281_v0, %v1277_v63  ;;  %v2975_v50 = vor.u32 %v3368_v46, %v2974_v45  ;;  %v2954_v51 = vld [vmem:[#allocation5 + $0x48] sm:$0xf]  ;;  %v3363_v53 = vld [vmem:[#allocation5 + $0x4c] sm:$0xf] }
 0x2ee   :  { %v1291_v2 = vsub.f32 1.0, %v1282_v1  ;;  %v1293_v61 = vmul.f32 %v1282_v1, %v3671_v12  ;;  %v3004_v12 = vld [vmem:[#allocation5 + $0xb4] sm:$0xf0]  ;;  %1744 = vmatpush.bf16.msrb.mxu0 %v2987_v37  ;;  %v2955_v63 = vor.u32 %v3364_v52, %v2954_v51  ;;  %v2963_v1 = vor.u32 %v3365_v60, %v2962_v58 }
 0x2ef   :  { %v1289_v62 = vadd.f32 %v1287_v56, %v1286_v59  ;;  %v3007_v15 = vor.u32 %v3375_v10, %v3004_v12  ;;  %v2956_v56 = vld [vmem:[#allocation5 + $0x54] sm:$0xf0]  ;;  %1719 = vmatpush.bf16.msra.mxu2 %v2967_v43 }
 0x2f0   :  { %v2959_v0 = vor.u32 %v3363_v53, %v2956_v56 }
 0x2f1   :  { %3469 = vtanh.f32 %v1289_v62  ;;  %1729 = vmatpush.bf16.msra.mxu3 %v3007_v15  ;;  %v3357_v15 = vld [vmem:[#allocation5 + $0x1c] sm:$0xf] }
 0x2f2   :  { %1745 = vmatpush.bf16.msrb.mxu0 %v2975_v50  ;;  %v2935_v22 = vor.u32 %v3357_v15, %v2932_v16  ;;  %v3096_v15 = vld [vmem:[#allocation5 + $0x98] sm:$0xf]  ;;  %v3398_v16 = vld [vmem:[#allocation5 + $0xa0] sm:$0xf0] }
 0x2f3   :  { %1720 = vmatpush.bf16.msra.mxu2 %v2955_v63 }
 0x2f5   :  { %1730 = vmatpush.bf16.msra.mxu3 %v2995_v26  ;;  %v2920_v26 = vld [vmem:[#allocation5 + $0xc] sm:$0xf0] }
 0x2f6   :  { %1746 = vmatpush.bf16.msrb.mxu0 %v2963_v1  ;;  %v3400_v1 = vld [vmem:[#allocation5 + $0xb0] sm:$0xf0] }
 0x2f7   :  { %v3470_v3 = vpop.eup %3469 }
 0x2f8   :  { %v1292_v4 = vmul.f32 %v3470_v3, %v1291_v2  ;;  %v2942_v2 = vld [vmem:[#allocation5 + $0x30] sm:$0xf]  ;;  %v3361_v3 = vld [vmem:[#allocation5 + $0x38] sm:$0xf0] }
 0x2f9   :  { %1731 = vmatpush.bf16.msra.mxu3 %v2983_v36  ;;  %v2943_v10 = vor.u32 %v3361_v3, %v2942_v2  ;;  %v3399_v2 = vld [vmem:[#allocation5 + $0xac] sm:$0xf] }
 0x2fa   :  { %v3691_v6 = vadd.f32 %v1293_v61, %v1292_v4  ;;  %v3360_v4 = vld [vmem:[#allocation5 + $0x34] sm:$0xf]  ;;  %1747 = vmatpush.bf16.msrb.mxu0 %v2951_v13 }
 0x2fb   :  { %1721 = vmatpush.bf16.msra.mxu2 %v2943_v10  ;;  %v3728_v10 = vld [vmem:[#allocation2 + $0x5] ss:$8 sm:$0x7] }
 0x2fc   :  { %1295 = vst [vmem:[%s3793_s6 + $0x3] sm:$0x1] %v3691_v6  ;;  %v1298_v21 = vpack.c.bf16 %v3691_v6, %v3691_v6 }
 0x2fd   :  { %1732 = vmatpush.bf16.msra.mxu3 %v2971_v49  ;;  %v1544_v49 = vrot.slane %v3699_v7, 2 }
 0x2fe   :  { %1467 = vmatmul.bf16.vlgmr.msrb.gmra.mxu3 %v1298_v21  ;;  %1480 = vmatmul.bf16.vlgmr.msra.gmra.mxu0 %v1298_v21 }
 0x2ff   :  { %1493 = vmatmul.bf16.vlgmr.msra.gmra.mxu1 %v1298_v21  ;;  %v2944_v21 = vld [vmem:[#allocation5 + $0x3c] sm:$0xf0] }
 0x300   :  { %v2947_v57 = vor.u32 %v3360_v4, %v2944_v21  ;;  %v3102_v4 = vld [vmem:[#allocation5 + $0xb4] sm:$0xf0] }
 0x301   :  { %1733 = vmatpush.bf16.msra.mxu3 %v2959_v0  ;;  %v3105_v8 = vor.u32 %v3399_v2, %v3102_v4  ;;  %v3028_v4 = vld [vmem:[#allocation5 + $0x18] sm:$0xf] }
 0x305   :  { %1734 = vmatpush.bf16.msra.mxu3 %v2947_v57  ;;  %v3396_v57 = vld [vmem:[#allocation5 + $0x94] sm:$0xf] }
 0x309   :  { %1735 = vmatpush.bf16.msra.mxu3 %v2935_v22 }
 0x37b   :  { %v1481_v55 = vpop.f32.mrf.mxu0 }
 0x37c   :  { %v1521_v17 = vadd.f32 %v1519_v14, %v1481_v55  ;;  %v3702_v18 = vpop.f32.mrf.mxu1  ;;  %v3358_v14 = vld [vmem:[#allocation5 + $0x20] sm:$0xf0] }
 0x37d   :  { %v2931_v54 = vor.u32 %v3358_v14, %v2930_v11  ;;  %v1542_v44 = vadd.f32 %v1541_v40, %v3702_v18  ;;  %v3088_v11 = vld [vmem:[#allocation5 + $0x90] sm:$0xf]  ;;  %v3090_v14 = vld [vmem:[#allocation5 + $0x9c] sm:$0xf0]  ;;  %v3072_v40 = vld [vmem:[#allocation5 + $0x68] sm:$0xf] }
 0x37e   :  { %v2915_v25 = vmul.f32 -1.442695, %v1521_v17  ;;  %v2938_v17 = vld [vmem:[#allocation5 + $0x20] sm:$0xf] }
 0x37f   :  { %v2939_v23 = vor.u32 %v3359_v19, %v2938_v17  ;;  %1722 = vmatpush.bf16.msra.mxu2 %v2931_v54  ;;  %v3093_v17 = vor.u32 %v3396_v57, %v3090_v14  ;;  %v3097_v19 = vor.u32 %v3398_v16, %v3096_v15  ;;  %v3036_v57 = vld [vmem:[#allocation5 + $0x20] sm:$0xf] }
 0x380   :  { %3471 = vpow2.f32 %v2915_v25  ;;  %v3354_v25 = vld [vmem:[#allocation5 + $0x4] sm:$0xf] }
 0x381   :  { %v1468_v31 = vpop.f32.mrf.mxu3  ;;  %1748 = vmatpush.bf16.msrb.mxu0 %v2939_v23 }
 0x382   :  { %v1498_v35 = vadd.f32 %v1468_v31, %v3699_v7  ;;  %v2923_v31 = vor.u32 %v3354_v25, %v2920_v26  ;;  %v3393_v25 = vld [vmem:[#allocation5 + $0x7c] sm:$0xf]  ;;  %v3077_v26 = vor.u32 %v3394_v5, %v3076_v24 }
 0x383   :  { %v1483_v41 = vpop.f32.mrf.mxu0  ;;  %1723 = vmatpush.bf16.msra.mxu2 %v2919_v30 }
 0x384   :  { %v2914_v47 = vmul.f32 -1.442695, %v1498_v35  ;;  %v1496_v48 = vpop.f32.mrf.mxu1  ;;  %1736 = vmatpush.bf16.msra.mxu3 %v2923_v31 }
 0x385   :  { %1749 = vmatpush.bf16.msrb.mxu0 %v2927_v32 }
 0x386   :  { %v3472_v59 = vpop.eup %3471  ;;  %3473 = vpow2.f32 %v2914_v47 }
 0x387   :  { %v3705_v62 = vadd.f32 1.0, %v3472_v59  ;;  %1986 = vmatpush.bf16.msrb.mxu2 %v3105_v8 }
 0x389   :  { %v1470_v61 = vpop.f32.mrf.mxu3  ;;  %3475 = vrcp.f32 %v3705_v62  ;;  %v1537_v48 = vand.u32 2147483648, %v3705_v62  ;;  %vm1531_vm5 = vweird.f32 %v3705_v62  ;;  %v1535_v51 = vand.u32 2147483647, %v3705_v62 }
 0x38a   :  { %v3108_v61 = vld [vmem:[#allocation5 + $0xb0] sm:$0xf] }
 0x38b   :  { %v1538_v56 = vor.u32 1.1754944e-38, %v1537_v48  ;;  %vm1536_vm7 = vcmp.eq.f32.partialorder %v1535_v51, 8.507059e+37  ;;  %1987 = vmatpush.bf16.msrb.mxu2 %v3093_v17  ;;  %v3060_v48 = vld [vmem:[#allocation5 + $0x50] sm:$0xf]  ;;  %v3379_v17 = vld [vmem:[#allocation5 + $0x8] sm:$0xf0] }
 0x38c   :  { %v3474_v12 = vpop.eup %3473 }
 0x38d   :  { %v1502_v55 = vadd.f32 1.0, %v3474_v12  ;;  %v3397_v12 = vld [vmem:[#allocation5 + $0x98] sm:$0xf0] }
 0x38e   :  { %v3089_v13 = vor.u32 %v3397_v12, %v3088_v11  ;;  %v3381_v11 = vld [vmem:[#allocation5 + $0x1c] sm:$0xf]  ;;  %v3030_v12 = vld [vmem:[#allocation5 + $0x24] sm:$0xf0] }
 0x38f   :  { %3477 = vrcp.f32 %v1502_v55  ;;  %v3476_v20 = vpop.eup %3475  ;;  %v1514_v36 = vand.u32 2147483648, %v1502_v55  ;;  %v1512_v38 = vand.u32 2147483647, %v1502_v55  ;;  %vm1508_vm1 = vweird.f32 %v1502_v55 }
 0x390   :  { %v1527_v29 = vmul.f32 %v3476_v20, %v3705_v62  ;;  %vm1532_vm4 = vweird.f32 %v3476_v20  ;;  %v3100_v62 = vld [vmem:[#allocation5 + $0xa8] sm:$0xf]  ;;  %v3033_v15 = vor.u32 %v3381_v11, %v3030_v12 }
 0x391   :  { %v1515_v43 = vor.u32 1.1754944e-38, %v1514_v36  ;;  %vm1513_vm3 = vcmp.eq.f32.partialorder %v1512_v38, 8.507059e+37  ;;  %vm1533_vm6 = vmor %vm1531_vm5, %vm1532_vm4  ;;  %v3101_v3 = vor.u32 %v3400_v1, %v3100_v62  ;;  %v3390_v36 = vld [vmem:[#allocation5 + $0x64] sm:$0xf] }
 0x392   :  { %v1528_v34 = vsub.f32 1.0, %v1527_v29  ;;  %v3395_v29 = vld [vmem:[#allocation5 + $0x88] sm:$0xf0] }
 0x393   :  { %1973 = vmatpush.bf16.msrb.mxu1 %v3101_v3 }
 0x394   :  { %v1529_v39 = vmul.f32 %v3476_v20, %v1528_v34  ;;  %v3064_v34 = vld [vmem:[#allocation5 + $0x60] sm:$0xf] }
 0x395   :  { %v3478_v42 = vpop.eup %3477 }
 0x396   :  { %v1504_v33 = vmul.f32 %v3478_v42, %v1502_v55  ;;  %vm1509_vm0 = vweird.f32 %v3478_v42  ;;  %v1530_v46 = vadd.f32 %v3476_v20, %v1529_v39  ;;  %v1776_v55 = vrot.slane %v3728_v10, 1 }
 0x397   :  { %vm1510_vm2 = vmor %vm1508_vm1, %vm1509_vm0  ;;  %1974 = vmatpush.bf16.msrb.mxu1 %v3089_v13  ;;  %v3383_v13 = vld [vmem:[#allocation5 + $0x28] sm:$0xf0] }
 0x398   :  { %v1505_v35 = vsub.f32 1.0, %v1504_v33  ;;  %v1534_v53 = vsel %vm1533_vm6, %v3476_v20, %v1530_v46  ;;  %v3085_v33 = vor.u32 %v3395_v29, %v3084_v28  ;;  %v3387_v46 = vld [vmem:[#allocation5 + $0x4c] sm:$0xf]  ;;  %v3037_v16 = vor.u32 %v3383_v13, %v3036_v57 }
 0x399   :  { %v1539_v18 = vsel %vm1536_vm7, %v1538_v56, %v1534_v53 }
 0x39a   :  { %v1506_v37 = vmul.f32 %v3478_v42, %v1505_v35  ;;  %v1548_v58 = vsub.f32 1.0, %v1539_v18  ;;  %v1550_v63 = vmul.f32 %v1539_v18, %v3691_v6  ;;  %v3401_v6 = vld [vmem:[#allocation5 + $0xb8] sm:$0xf0]  ;;  %v3391_v35 = vld [vmem:[#allocation5 + $0x68] sm:$0xf0] }
 0x39b   :  { %v3109_v9 = vor.u32 %v3401_v6, %v3108_v61  ;;  %1975 = vmatpush.bf16.msrb.mxu1 %v3077_v26  ;;  %v3065_v38 = vor.u32 %v3391_v35, %v3064_v34  ;;  %v3040_v18 = vld [vmem:[#allocation5 + $0x30] sm:$0xf] }
 0x39c   :  { %v1507_v41 = vadd.f32 %v3478_v42, %v1506_v37  ;;  %v3066_v37 = vld [vmem:[#allocation5 + $0x6c] sm:$0xf0] }
 0x39d   :  { %1999 = vmatpush.bf16.msrb.mxu3 %v3109_v9  ;;  %v3069_v39 = vor.u32 %v3390_v36, %v3066_v37  ;;  %v3382_v9 = vld [vmem:[#allocation5 + $0x20] sm:$0xf0] }
 0x39e   :  { %v1511_v45 = vsel %vm1510_vm2, %v3478_v42, %v1507_v41  ;;  %v3081_v42 = vor.u32 %v3393_v25, %v3078_v27  ;;  %v3392_v41 = vld [vmem:[#allocation5 + $0x70] sm:$0xf0]  ;;  %v3029_v14 = vor.u32 %v3382_v9, %v3028_v4 }
 0x39f   :  { %v1516_v47 = vsel %vm1513_vm3, %v1515_v43, %v1511_v45  ;;  %v3052_v43 = vld [vmem:[#allocation5 + $0x48] sm:$0xf]  ;;  %v3388_v45 = vld [vmem:[#allocation5 + $0x50] sm:$0xf0]  ;;  %1976 = vmatpush.bf16.msrb.mxu1 %v3065_v38 }
 0x3a0   :  { %v1543_v50 = vmul.f32 %v1542_v44, %v1516_v47  ;;  %1988 = vmatpush.bf16.msrb.mxu2 %v3081_v42  ;;  %v3073_v44 = vor.u32 %v3392_v41, %v3072_v40  ;;  %v3054_v47 = vld [vmem:[#allocation5 + $0x54] sm:$0xf0]  ;;  %v3753_v9 = vld [vmem:[#allocation2 + $0x6] ss:$8 sm:$0x7] }
 0x3a1   :  { %2000 = vmatpush.bf16.msrb.mxu3 %v3097_v19  ;;  %v3057_v53 = vor.u32 %v3387_v46, %v3054_v47  ;;  %v3378_v19 = vld [vmem:[#allocation5 + $0x4] sm:$0xf] }
 0x3a2   :  { %v1546_v52 = vadd.f32 %v1544_v49, %v1543_v50  ;;  %v3389_v49 = vld [vmem:[#allocation5 + $0x58] sm:$0xf0] }
 0x3a3   :  { %v3061_v56 = vor.u32 %v3389_v49, %v3060_v48 }
 0x3a4   :  { %3479 = vtanh.f32 %v1546_v52  ;;  %v3053_v52 = vor.u32 %v3388_v45, %v3052_v43  ;;  %1989 = vmatpush.bf16.msrb.mxu2 %v3069_v39  ;;  %v1801_v43 = vrot.slane %v3728_v10, 2 }
 0x3a5   :  { %2001 = vmatpush.bf16.msrb.mxu3 %v3085_v33  ;;  %v1798_v33 = vld [vmem:[%s3791_s4] sm:$0x1] }
 0x3a6   :  { %1977 = vmatpush.bf16.msrb.mxu1 %v3053_v52 }
 0x3a8   :  { %1990 = vmatpush.bf16.msrb.mxu2 %v3057_v53 }
 0x3a9   :  { %2002 = vmatpush.bf16.msrb.mxu3 %v3073_v44 }
 0x3aa   :  { %v3480_v59 = vpop.eup %3479 }
 0x3ab   :  { %v1549_v60 = vmul.f32 %v3480_v59, %v1548_v58  ;;  %v3385_v58 = vld [vmem:[#allocation5 + $0x38] sm:$0xf0]  ;;  %v3384_v59 = vld [vmem:[#allocation5 + $0x34] sm:$0xf] }
 0x3ac   :  { %v3041_v3 = vor.u32 %v3385_v58, %v3040_v18  ;;  %v3424_v18 = vld [vmem:[#allocation5 + $0xb0] sm:$0xf0]  ;;  %v3423_v58 = vld [vmem:[#allocation5 + $0xac] sm:$0xf] }
 0x3ad   :  { %v3718_v0 = vadd.f32 %v1550_v63, %v1549_v60  ;;  %v3042_v60 = vld [vmem:[#allocation5 + $0x3c] sm:$0xf0]  ;;  %v3048_v63 = vld [vmem:[#allocation5 + $0x38] sm:$0xf]  ;;  %2003 = vmatpush.bf16.msrb.mxu3 %v3061_v56  ;;  %v3198_v56 = vld [vmem:[#allocation5 + $0xa8] sm:$0xf] }
 0x3ae   :  { %v3045_v6 = vor.u32 %v3384_v59, %v3042_v60  ;;  %1978 = vmatpush.bf16.msrb.mxu1 %v3041_v3  ;;  %v3199_v59 = vor.u32 %v3424_v18, %v3198_v56  ;;  %v3200_v60 = vld [vmem:[#allocation5 + $0xb4] sm:$0xf0]  ;;  %v3420_v3 = vld [vmem:[#allocation5 + $0x94] sm:$0xf]  ;;  %v3410_v18 = vld [vmem:[#allocation5 + $0x40] sm:$0xf0] }
 0x3af   :  { %1552 = vst [vmem:[%s3793_s6 + $0x4] sm:$0x1] %v3718_v0  ;;  %v1555_v7 = vpack.c.bf16 %v3718_v0, %v3718_v0 }
 0x3b0   :  { %1991 = vmatpush.bf16.msrb.mxu2 %v3045_v6  ;;  %2230 = vmatpush.bf16.msra.mxu0 %v3199_v59  ;;  %v3194_v6 = vld [vmem:[#allocation5 + $0x98] sm:$0xf] }
 0x3b1   :  { %1724 = vmatmul.bf16.vlgmr.msra.gmra.mxu2 %v1555_v7  ;;  %1737 = vmatmul.bf16.vlgmr.msra.gmra.mxu3 %v1555_v7 }
 0x3b2   :  { %1750 = vmatmul.bf16.vlgmr.msrb.gmra.mxu0 %v1555_v7  ;;  %v3386_v7 = vld [vmem:[#allocation5 + $0x40] sm:$0xf0]  ;;  %1979 = vmatpush.bf16.msrb.mxu1 %v3029_v14  ;;  %v3174_v14 = vld [vmem:[#allocation5 + $0x78] sm:$0xf] }
 0x3b3   :  { %v3049_v8 = vor.u32 %v3386_v7, %v3048_v63  ;;  %v3206_v63 = vld [vmem:[#allocation5 + $0xb0] sm:$0xf]  ;;  %v3203_v7 = vor.u32 %v3423_v58, %v3200_v60 }
 0x3b4   :  { %1992 = vmatpush.bf16.msrb.mxu2 %v3033_v15  ;;  %v3418_v15 = vld [vmem:[#allocation5 + $0x80] sm:$0xf0] }
 0x3b5   :  { %2004 = vmatpush.bf16.msrb.mxu3 %v3049_v8  ;;  %v3422_v8 = vld [vmem:[#allocation5 + $0xa0] sm:$0xf0] }
 0x3b6   :  { %v3195_v57 = vor.u32 %v3422_v8, %v3194_v6  ;;  %v3114_v8 = vld [vmem:[#allocation5] sm:$0xf] }
 0x3b9   :  { %2005 = vmatpush.bf16.msrb.mxu3 %v3037_v16  ;;  %v3417_v16 = vld [vmem:[#allocation5 + $0x7c] sm:$0xf] }
 0x42f   :  { %v3726_v21 = vpop.f32.mrf.mxu0 }
 0x430   :  { %v1799_v37 = vadd.f32 %v1798_v33, %v3726_v21 }
 0x434   :  { %v1725_v54 = vpop.f32.mrf.mxu2  ;;  %v1738_v20 = vpop.f32.mrf.mxu3 }
 0x435   :  { %v1755_v22 = vadd.f32 %v1725_v54, %v3728_v10  ;;  %v1778_v23 = vadd.f32 %v1776_v55, %v1738_v20  ;;  %v3016_v55 = vld [vmem:[#allocation5] sm:$0xf]  ;;  %v3018_v54 = vld [vmem:[#allocation5 + $0xc] sm:$0xf0]  ;;  %v3024_v20 = vld [vmem:[#allocation5 + $0x8] sm:$0xf] }
 0x436   :  { %v3017_v24 = vor.u32 %v3379_v17, %v3016_v55  ;;  %v3021_v26 = vor.u32 %v3378_v19, %v3018_v54  ;;  %v3175_v17 = vor.u32 %v3418_v15, %v3174_v14  ;;  %v3176_v19 = vld [vmem:[#allocation5 + $0x84] sm:$0xf0]  ;;  %v3182_v54 = vld [vmem:[#allocation5 + $0x80] sm:$0xf] }
 0x437   :  { %v3012_v30 = vmul.f32 -1.442695, %v1755_v22  ;;  %v3013_v31 = vmul.f32 -1.442695, %v1778_v23  ;;  %v1753_v32 = vpop.f32.mrf.mxu0  ;;  %v3380_v22 = vld [vmem:[#allocation5 + $0x10] sm:$0xf0] }
 0x438   :  { %v3025_v27 = vor.u32 %v3380_v22, %v3024_v20  ;;  %1980 = vmatpush.bf16.msrb.mxu1 %v3017_v24  ;;  %1993 = vmatpush.bf16.msrb.mxu2 %v3021_v26  ;;  %v3179_v20 = vor.u32 %v3417_v16, %v3176_v19  ;;  %v3419_v22 = vld [vmem:[#allocation5 + $0x88] sm:$0xf0]  ;;  %v3122_v15 = vld [vmem:[#allocation5 + $0x8] sm:$0xf]  ;;  %v3404_v16 = vld [vmem:[#allocation5 + $0x10] sm:$0xf0] }
 0x439   :  { %3481 = vpow2.f32 %v3012_v30  ;;  %v3183_v24 = vor.u32 %v3419_v22, %v3182_v54  ;;  %v3415_v26 = vld [vmem:[#allocation5 + $0x68] sm:$0xf0] }
 0x43a   :  { %3483 = vpow2.f32 %v3013_v31  ;;  %2006 = vmatpush.bf16.msrb.mxu3 %v3025_v27  ;;  %v3414_v27 = vld [vmem:[#allocation5 + $0x64] sm:$0xf] }
 0x43c   :  { %v1727_v50 = vpop.f32.mrf.mxu2  ;;  %v1740_v51 = vpop.f32.mrf.mxu3  ;;  %2243 = vmatpush.bf16.msra.mxu1 %v3203_v7  ;;  %v3405_v7 = vld [vmem:[#allocation5 + $0x1c] sm:$0xf] }
 0x43f   :  { %v3482_v62 = vpop.eup %3481 }
 0x440   :  { %v3484_v1 = vpop.eup %3483  ;;  %v1759_v2 = vadd.f32 1.0, %v3482_v62 }
 0x441   :  { %v3732_v61 = vadd.f32 1.0, %v3484_v1  ;;  %v3186_v1 = vld [vmem:[#allocation5 + $0x90] sm:$0xf] }
 0x442   :  { %3485 = vrcp.f32 %v1759_v2  ;;  %v1771_v30 = vand.u32 2147483648, %v1759_v2  ;;  %v1769_v42 = vand.u32 2147483647, %v1759_v2  ;;  %vm1765_vm9 = vweird.f32 %v1759_v2 }
 0x443   :  { %3487 = vrcp.f32 %v3732_v61  ;;  %v1794_v44 = vand.u32 2147483648, %v3732_v61  ;;  %vm1788_vm13 = vweird.f32 %v3732_v61  ;;  %v1792_v45 = vand.u32 2147483647, %v3732_v61 }
 0x444   :  { %v1772_v36 = vor.u32 1.1754944e-38, %v1771_v30  ;;  %vm1770_vm11 = vcmp.eq.f32.partialorder %v1769_v42, 8.507059e+37  ;;  %v3416_v42 = vld [vmem:[#allocation5 + $0x70] sm:$0xf0] }
 0x445   :  { %v1795_v48 = vor.u32 1.1754944e-38, %v1794_v44  ;;  %vm1793_vm15 = vcmp.eq.f32.partialorder %v1792_v45, 8.507059e+37  ;;  %v3158_v44 = vld [vmem:[#allocation5 + $0x50] sm:$0xf]  ;;  %v3413_v45 = vld [vmem:[#allocation5 + $0x58] sm:$0xf0] }
 0x448   :  { %v3486_v23 = vpop.eup %3485 }
 0x449   :  { %v3488_v5 = vpop.eup %3487  ;;  %v1761_v25 = vmul.f32 %v3486_v23, %v1759_v2  ;;  %vm1766_vm8 = vweird.f32 %v3486_v23  ;;  %v3421_v2 = vld [vmem:[#allocation5 + $0x98] sm:$0xf0] }
 0x44a   :  { %v1784_v28 = vmul.f32 %v3488_v5, %v3732_v61  ;;  %vm1767_vm10 = vmor %vm1765_vm9, %vm1766_vm8  ;;  %vm1789_vm12 = vweird.f32 %v3488_v5  ;;  %v3187_v4 = vor.u32 %v3421_v2, %v3186_v1  ;;  %v3188_v61 = vld [vmem:[#allocation5 + $0x9c] sm:$0xf0] }
 0x44b   :  { %v1762_v29 = vsub.f32 1.0, %v1761_v25  ;;  %vm1790_vm14 = vmor %vm1788_vm13, %vm1789_vm12  ;;  %v3191_v12 = vor.u32 %v3420_v3, %v3188_v61  ;;  %v3162_v25 = vld [vmem:[#allocation5 + $0x60] sm:$0xf] }
 0x44c   :  { %v1785_v31 = vsub.f32 1.0, %v1784_v28  ;;  %2231 = vmatpush.bf16.msra.mxu0 %v3187_v4  ;;  %v3163_v30 = vor.u32 %v3415_v26, %v3162_v25  ;;  %v3134_v1 = vld [vmem:[#allocation5 + $0x20] sm:$0xf]  ;;  %v3407_v4 = vld [vmem:[#allocation5 + $0x28] sm:$0xf0] }
 0x44d   :  { %v1763_v32 = vmul.f32 %v3486_v23, %v1762_v29  ;;  %2244 = vmatpush.bf16.msra.mxu1 %v3191_v12  ;;  %v3135_v12 = vor.u32 %v3407_v4, %v3134_v1  ;;  %v2055_v25 = vld [vmem:[%s3791_s4] sm:$0x1] }
 0x44e   :  { %v1786_v34 = vmul.f32 %v3488_v5, %v1785_v31  ;;  %v3164_v31 = vld [vmem:[#allocation5 + $0x6c] sm:$0xf0] }
 0x44f   :  { %v1764_v35 = vadd.f32 %v3486_v23, %v1763_v32  ;;  %v3170_v32 = vld [vmem:[#allocation5 + $0x68] sm:$0xf] }
 0x450   :  { %v1787_v40 = vadd.f32 %v3488_v5, %v1786_v34  ;;  %2232 = vmatpush.bf16.msra.mxu0 %v3175_v17  ;;  %v3167_v34 = vor.u32 %v3414_v27, %v3164_v31 }
 0x451   :  { %v1768_v38 = vsel %vm1767_vm10, %v3486_v23, %v1764_v35  ;;  %v2033_v23 = vrot.slane %v3753_v9, 1  ;;  %2245 = vmatpush.bf16.msra.mxu1 %v3179_v20  ;;  %v3171_v35 = vor.u32 %v3416_v42, %v3170_v32  ;;  %v3123_v20 = vor.u32 %v3404_v16, %v3122_v15 }
 0x452   :  { %v1773_v39 = vsel %vm1770_vm11, %v1772_v36, %v1768_v38  ;;  %v1791_v47 = vsel %vm1790_vm14, %v3488_v5, %v1787_v40  ;;  %v3412_v38 = vld [vmem:[#allocation5 + $0x50] sm:$0xf0]  ;;  %v2058_v42 = vrot.slane %v3753_v9, 2 }
 0x453   :  { %v1800_v41 = vmul.f32 %v1799_v37, %v1773_v39  ;;  %v1796_v21 = vsel %vm1793_vm15, %v1795_v48, %v1791_v47  ;;  %v3150_v37 = vld [vmem:[#allocation5 + $0x48] sm:$0xf]  ;;  %v3411_v39 = vld [vmem:[#allocation5 + $0x4c] sm:$0xf]  ;;  %v3159_v48 = vor.u32 %v3413_v45, %v3158_v44 }
 0x454   :  { %v1805_v49 = vsub.f32 1.0, %v1796_v21  ;;  %v1807_v52 = vmul.f32 %v1796_v21, %v3718_v0  ;;  %v3425_v0 = vld [vmem:[#allocation5 + $0xb8] sm:$0xf0]  ;;  %2233 = vmatpush.bf16.msra.mxu0 %v3163_v30  ;;  %v3138_v21 = vld [vmem:[#allocation5 + $0x30] sm:$0xf] }
 0x455   :  { %v1803_v46 = vadd.f32 %v1801_v43, %v1800_v41  ;;  %v3207_v62 = vor.u32 %v3425_v0, %v3206_v63  ;;  %2246 = vmatpush.bf16.msra.mxu1 %v3167_v34  ;;  %v3151_v41 = vor.u32 %v3412_v38, %v3150_v37  ;;  %v3152_v43 = vld [vmem:[#allocation5 + $0x54] sm:$0xf0]  ;;  %v3406_v0 = vld [vmem:[#allocation5 + $0x20] sm:$0xf0] }
 0x456   :  { %v3155_v47 = vor.u32 %v3411_v39, %v3152_v43  ;;  %v3126_v63 = vld [vmem:[#allocation5 + $0x18] sm:$0xf] }
 0x457   :  { %3489 = vtanh.f32 %v1803_v46  ;;  %2256 = vmatpush.bf16.msra.mxu2 %v3207_v62  ;;  %v3128_v62 = vld [vmem:[#allocation5 + $0x24] sm:$0xf0]  ;;  %v3127_v3 = vor.u32 %v3406_v0, %v3126_v63 }
 0x458   :  { %2234 = vmatpush.bf16.msra.mxu0 %v3151_v41  ;;  %v3131_v6 = vor.u32 %v3405_v7, %v3128_v62 }
 0x459   :  { %2247 = vmatpush.bf16.msra.mxu1 %v3155_v47 }
 0x45b   :  { %2257 = vmatpush.bf16.msra.mxu2 %v3195_v57  ;;  %v3402_v57 = vld [vmem:[#allocation5 + $0x4] sm:$0xf] }
 0x45d   :  { %v3490_v50 = vpop.eup %3489 }
 0x45e   :  { %v1806_v51 = vmul.f32 %v3490_v50, %v1805_v49  ;;  %v3409_v49 = vld [vmem:[#allocation5 + $0x38] sm:$0xf0] }
 0x45f   :  { %2258 = vmatpush.bf16.msra.mxu2 %v3183_v24  ;;  %v3139_v50 = vor.u32 %v3409_v49, %v3138_v21 }
 0x460   :  { %v3745_v53 = vadd.f32 %v1807_v52, %v1806_v51  ;;  %v3408_v51 = vld [vmem:[#allocation5 + $0x34] sm:$0xf]  ;;  %v3140_v52 = vld [vmem:[#allocation5 + $0x3c] sm:$0xf0] }
 0x461   :  { %v3143_v59 = vor.u32 %v3408_v51, %v3140_v52  ;;  %2235 = vmatpush.bf16.msra.mxu0 %v3139_v50 }
 0x462   :  { %1809 = vst [vmem:[%s3793_s6 + $0x5] sm:$0x1] %v3745_v53  ;;  %v1812_v10 = vpack.c.bf16 %v3745_v53, %v3745_v53 }
 0x463   :  { %2259 = vmatpush.bf16.msra.mxu2 %v3171_v35  ;;  %2248 = vmatpush.bf16.msra.mxu1 %v3143_v59 }
 0x464   :  { %1981 = vmatmul.bf16.vlgmr.msrb.gmra.mxu1 %v1812_v10  ;;  %1994 = vmatmul.bf16.vlgmr.msrb.gmra.mxu2 %v1812_v10 }
 0x465   :  { %2007 = vmatmul.bf16.vlgmr.msrb.gmra.mxu3 %v1812_v10  ;;  %v3146_v10 = vld [vmem:[#allocation5 + $0x38] sm:$0xf]  ;;  %2236 = vmatpush.bf16.msra.mxu0 %v3127_v3 }
 0x466   :  { %v3147_v60 = vor.u32 %v3410_v18, %v3146_v10 }
 0x467   :  { %2260 = vmatpush.bf16.msra.mxu2 %v3159_v48  ;;  %2249 = vmatpush.bf16.msra.mxu1 %v3131_v6  ;;  %v2068_v48 = vld [vmem:[#allocation2 + $0x7] ss:$8 sm:$0x7] }
 0x468   :  { %v2290_v21 = vrot.slane %v2068_v48, 1 }
 0x46b   :  { %2261 = vmatpush.bf16.msra.mxu2 %v3147_v60 }
 0x46f   :  { %2262 = vmatpush.bf16.msra.mxu2 %v3135_v12 }
 0x473   :  { %2263 = vmatpush.bf16.msra.mxu2 %v3123_v20 }
 0x4e1   :  { %v1982_v11 = vpop.f32.mrf.mxu1 }
 0x4e2   :  { %v2012_v13 = vadd.f32 %v1982_v11, %v3753_v9  ;;  %v3403_v11 = vld [vmem:[#allocation5 + $0x8] sm:$0xf0] }
 0x4e3   :  { %v3115_v17 = vor.u32 %v3403_v11, %v3114_v8 }
 0x4e4   :  { %v3110_v55 = vmul.f32 -1.442695, %v2012_v13  ;;  %v3116_v13 = vld [vmem:[#allocation5 + $0xc] sm:$0xf0] }
 0x4e5   :  { %v3119_v19 = vor.u32 %v3402_v57, %v3116_v13  ;;  %2237 = vmatpush.bf16.msra.mxu0 %v3115_v17  ;;  %v2312_v57 = vld [vmem:[%s3791_s4] sm:$0x1] }
 0x4e6   :  { %3491 = vpow2.f32 %v3110_v55 }
 0x4e7   :  { %v1995_v5 = vpop.f32.mrf.mxu2  ;;  %2250 = vmatpush.bf16.msra.mxu1 %v3119_v19  ;;  %v2315_v19 = vrot.slane %v2068_v48, 2 }
 0x4e8   :  { %v2035_v28 = vadd.f32 %v2033_v23, %v1995_v5  ;;  %v3757_v29 = vpop.f32.mrf.mxu3 }
 0x4e9   :  { %v1984_v33 = vpop.f32.mrf.mxu1  ;;  %v2056_v32 = vadd.f32 %v2055_v25, %v3757_v29 }
 0x4ea   :  { %v3111_v36 = vmul.f32 -1.442695, %v2035_v28 }
 0x4ec   :  { %v3492_v40 = vpop.eup %3491  ;;  %3493 = vpow2.f32 %v3111_v36 }
 0x4ed   :  { %v3759_v46 = vadd.f32 1.0, %v3492_v40 }
 0x4ef   :  { %3495 = vrcp.f32 %v3759_v46  ;;  %v1997_v56 = vpop.f32.mrf.mxu2  ;;  %v2028_v22 = vand.u32 2147483648, %v3759_v46  ;;  %v2026_v24 = vand.u32 2147483647, %v3759_v46  ;;  %vm2022_vm1 = vweird.f32 %v3759_v46 }
 0x4f0   :  { %v2010_v58 = vpop.f32.mrf.mxu3 }
 0x4f1   :  { %v2029_v28 = vor.u32 1.1754944e-38, %v2028_v22  ;;  %vm2027_vm3 = vcmp.eq.f32.partialorder %v2026_v24, 8.507059e+37 }
 0x4f2   :  { %v3494_v2 = vpop.eup %3493 }
 0x4f3   :  { %v2039_v61 = vadd.f32 1.0, %v3494_v2 }
 0x4f5   :  { %v3496_v14 = vpop.eup %3495  ;;  %3497 = vrcp.f32 %v2039_v61  ;;  %v2051_v35 = vand.u32 2147483648, %v2039_v61  ;;  %v2049_v37 = vand.u32 2147483647, %v2039_v61  ;;  %vm2045_vm5 = vweird.f32 %v2039_v61 }
 0x4f6   :  { %v2018_v55 = vmul.f32 %v3496_v14, %v3759_v46  ;;  %vm2023_vm0 = vweird.f32 %v3496_v14 }
 0x4f7   :  { %vm2024_vm2 = vmor %vm2022_vm1, %vm2023_vm0  ;;  %v2052_v40 = vor.u32 1.1754944e-38, %v2051_v35  ;;  %vm2050_vm7 = vcmp.eq.f32.partialorder %v2049_v37, 8.507059e+37 }
 0x4f8   :  { %v2019_v54 = vsub.f32 1.0, %v2018_v55 }
 0x4fa   :  { %v2020_v23 = vmul.f32 %v3496_v14, %v2019_v54 }
 0x4fb   :  { %v3498_v5 = vpop.eup %3497 }
 0x4fc   :  { %v2041_v26 = vmul.f32 %v3498_v5, %v2039_v61  ;;  %v2021_v27 = vadd.f32 %v3496_v14, %v2020_v23  ;;  %vm2046_vm4 = vweird.f32 %v3498_v5 }
 0x4fd   :  { %vm2047_vm6 = vmor %vm2045_vm5, %vm2046_vm4 }
 0x4fe   :  { %v2042_v30 = vsub.f32 1.0, %v2041_v26  ;;  %v2025_v31 = vsel %vm2024_vm2, %v3496_v14, %v2021_v27 }
 0x4ff   :  { %v2030_v33 = vsel %vm2027_vm3, %v2029_v28, %v2025_v31 }
 0x500   :  { %v2043_v34 = vmul.f32 %v3498_v5, %v2042_v30  ;;  %v2057_v36 = vmul.f32 %v2056_v32, %v2030_v33 }
 0x502   :  { %v2044_v38 = vadd.f32 %v3498_v5, %v2043_v34  ;;  %v2060_v39 = vadd.f32 %v2058_v42, %v2057_v36 }
 0x504   :  { %v2048_v41 = vsel %vm2047_vm6, %v3498_v5, %v2044_v38  ;;  %3499 = vtanh.f32 %v2060_v39 }
 0x505   :  { %v2053_v43 = vsel %vm2050_vm7, %v2052_v40, %v2048_v41 }
 0x506   :  { %v2062_v44 = vsub.f32 1.0, %v2053_v43  ;;  %v2064_v9 = vmul.f32 %v2053_v43, %v3745_v53 }
 0x50a   :  { %v3500_v45 = vpop.eup %3499 }
 0x50b   :  { %v2063_v29 = vmul.f32 %v3500_v45, %v2062_v44 }
 0x50d   :  { %v3772_v46 = vadd.f32 %v2064_v9, %v2063_v29 }
 0x50f   :  { %2066 = vst [vmem:[%s3793_s6 + $0x6] sm:$0x1] %v3772_v46  ;;  %v2069_v47 = vpack.c.bf16 %v3772_v46, %v3772_v46 }
 0x511   :  { %2238 = vmatmul.bf16.vlgmr.msra.gmra.mxu0 %v2069_v47  ;;  %2251 = vmatmul.bf16.vlgmr.msra.gmra.mxu1 %v2069_v47 }
 0x512   :  { %2264 = vmatmul.bf16.vlgmr.msra.gmra.mxu2 %v2069_v47 }
 0x58e   :  { %v2239_v49 = vpop.f32.mrf.mxu0  ;;  %v2252_v50 = vpop.f32.mrf.mxu1 }
 0x58f   :  { %v2269_v51 = vadd.f32 %v2239_v49, %v2068_v48  ;;  %v2292_v52 = vadd.f32 %v2290_v21, %v2252_v50 }
 0x591   :  { %v3208_v53 = vmul.f32 -1.442695, %v2269_v51  ;;  %v3209_v10 = vmul.f32 -1.442695, %v2292_v52 }
 0x593   :  { %3501 = vpow2.f32 %v3208_v53 }
 0x594   :  { %3503 = vpow2.f32 %v3209_v10 }
 0x595   :  { %v2265_v56 = vpop.f32.mrf.mxu2 }
 0x596   :  { %v2241_v18 = vpop.f32.mrf.mxu0  ;;  %v2254_v58 = vpop.f32.mrf.mxu1  ;;  %v2313_v16 = vadd.f32 %v2312_v57, %v2265_v56 }
 0x599   :  { %v3502_v59 = vpop.eup %3501 }
 0x59a   :  { %v3504_v60 = vpop.eup %3503  ;;  %v2273_v63 = vadd.f32 1.0, %v3502_v59 }
 0x59b   :  { %v2296_v0 = vadd.f32 1.0, %v3504_v60 }
 0x59c   :  { %3505 = vrcp.f32 %v2273_v63  ;;  %v2285_v6 = vand.u32 2147483648, %v2273_v63  ;;  %v2283_v11 = vand.u32 2147483647, %v2273_v63  ;;  %vm2279_vm9 = vweird.f32 %v2273_v63 }
 0x59d   :  { %3507 = vrcp.f32 %v2296_v0  ;;  %v2267_v7 = vpop.f32.mrf.mxu2  ;;  %v2308_v54 = vand.u32 2147483648, %v2296_v0  ;;  %vm2302_vm13 = vweird.f32 %v2296_v0  ;;  %v2306_v22 = vand.u32 2147483647, %v2296_v0 }
 0x59e   :  { %v2286_v14 = vor.u32 1.1754944e-38, %v2285_v6  ;;  %vm2284_vm11 = vcmp.eq.f32.partialorder %v2283_v11, 8.507059e+37 }
 0x59f   :  { %v2309_v5 = vor.u32 1.1754944e-38, %v2308_v54  ;;  %vm2307_vm15 = vcmp.eq.f32.partialorder %v2306_v22, 8.507059e+37 }
 0x5a2   :  { %v3506_v62 = vpop.eup %3505 }
 0x5a3   :  { %v3508_v1 = vpop.eup %3507  ;;  %v2275_v2 = vmul.f32 %v3506_v62, %v2273_v63  ;;  %vm2280_vm8 = vweird.f32 %v3506_v62 }
 0x5a4   :  { %v2298_v3 = vmul.f32 %v3508_v1, %v2296_v0  ;;  %vm2281_vm10 = vmor %vm2279_vm9, %vm2280_vm8  ;;  %vm2303_vm12 = vweird.f32 %v3508_v1 }
 0x5a5   :  { %v2276_v4 = vsub.f32 1.0, %v2275_v2  ;;  %vm2304_vm14 = vmor %vm2302_vm13, %vm2303_vm12 }
 0x5a6   :  { %v2299_v61 = vsub.f32 1.0, %v2298_v3 }
 0x5a7   :  { %v2277_v8 = vmul.f32 %v3506_v62, %v2276_v4 }
 0x5a8   :  { %v2300_v12 = vmul.f32 %v3508_v1, %v2299_v61 }
 0x5a9   :  { %v2278_v13 = vadd.f32 %v3506_v62, %v2277_v8 }
 0x5aa   :  { %v2301_v55 = vadd.f32 %v3508_v1, %v2300_v12 }
 0x5ab   :  { %v2282_v15 = vsel %vm2281_vm10, %v3506_v62, %v2278_v13 }
 0x5ac   :  { %v2287_v17 = vsel %vm2284_vm11, %v2286_v14, %v2282_v15  ;;  %v2305_v24 = vsel %vm2304_vm14, %v3508_v1, %v2301_v55 }
 0x5ad   :  { %v2314_v20 = vmul.f32 %v2313_v16, %v2287_v17  ;;  %v2310_v25 = vsel %vm2307_vm15, %v2309_v5, %v2305_v24 }
 0x5ae   :  { %v2319_v26 = vsub.f32 1.0, %v2310_v25  ;;  %v2321_v30 = vmul.f32 %v2310_v25, %v3772_v46 }
 0x5af   :  { %v2317_v23 = vadd.f32 %v2315_v19, %v2314_v20 }
 0x5b1   :  { %3509 = vtanh.f32 %v2317_v23 }
 0x5b7   :  { %v3510_v27 = vpop.eup %3509 }
 0x5b8   :  { %v2320_v28 = vmul.f32 %v3510_v27, %v2319_v26 }
 0x5ba   :  { %v2322_v31 = vadd.f32 %v2321_v30, %v2320_v28 }
 0x5bc   :  { %2323 = vst [vmem:[%s3793_s6 + $0x7] sm:$0x1] %v2322_v31 }
 0x5bd   :  { %2328 = vsyncpa [#allocation4], 1 }
 0x5be   :  { %2329 = vsyncpa [#allocation6], 1 }

</bundles_post_ra>
